<compile_context>
chip_gen: v7x
topology: tpu7x:2x2x1
jax: 0.10.0
libtpu: 0.0.40
codegen_flags: <defaults>
</compile_context>

<pallas_src>
import functools

import jax
import jax.numpy as jnp
from jax.experimental import pallas as pl
from jax.experimental.pallas import tpu as pltpu


# ----------------------------------------------------------------------------------
# Kernel
# ----------------------------------------------------------------------------------
def _gru_head_kernel(x_ref, slab_ref, bl_ref, out_ref, *, n_features, n_hidden):
    """2-layer GRU over T steps + linear head on the final top-layer state.

    x_ref   : (B, T, F) f32, batch-first (raw PyTorch layout)
    slab_ref: (3H + Fp + 8, LN) f32 packed parameter slab (see fuse_params)
    bl_ref  : (1, 1) f32 in SMEM — linear-head bias
    out_ref : (B, 1) f32
    """
    F, H = n_features, n_hidden
    B, T, _ = x_ref.shape
    LN = slab_ref.shape[1]                       # >= 4H lanes; gate cols [rz | gi_n | gh_n]
    Fp = ((F + 7) // 8) * 8                      # layer-0 weight rows padded to a sublane tile
    W1_OFF = H + Fp
    BIAS_OFF = 3 * H + Fp

    # Whole parameter set fits in a handful of vregs — load once, outside the loop.
    w0 = slab_ref[0:H + F, :]                    # rows [0,H)=wh0 side, [H,H+F)=wi0 side
    w1 = slab_ref[W1_OFF:W1_OFF + 2 * H, :]      # rows [0,H)=wi1 side, [H,2H)=wh1 side
    # Hoisted bias broadcasts (perf feedback #6): one broadcast each, not T per bias.
    b0 = jnp.broadcast_to(slab_ref[BIAS_OFF + 0:BIAS_OFF + 1, :], (B, LN))
    b1 = jnp.broadcast_to(slab_ref[BIAS_OFF + 1:BIAS_OFF + 2, :], (B, LN))
    wl = jnp.broadcast_to(slab_ref[BIAS_OFF + 2:BIAS_OFF + 3, 0:H], (B, H))
    bl = bl_ref[0, 0]

    x = x_ref[...]                               # (B, T, F), loaded once

    def cell(lhs, w, b, h_prev):
        # One fused MXU dot per GRU cell.  Column layout of w / b:
        #   [0,2H)   : W_r|W_z contributions from BOTH operand halves (+ b_ir+b_hr, b_iz+b_hz)
        #   [2H,3H)  : input-side n-gate   W_in x            (+ b_in)
        #   [3H,4H)  : hidden-side n-gate  W_hn h            (+ b_hn)
        # which reproduces PyTorch GRU:
        #   r,z = sigmoid(...);  n = tanh(gi_n + r * gh_n);  h' = (1 - z) * n + z * h
        g = jnp.dot(lhs, w, preferred_element_type=jnp.float32) + b
        rz = jax.nn.sigmoid(g[:, :2 * H])        # one EUP op covers r and z
        r = rz[:, :H]
        z = rz[:, H:2 * H]
        n = jnp.tanh(g[:, 2 * H:3 * H] + r * g[:, 3 * H:4 * H])
        return (1.0 - z) * n + z * h_prev

    h1 = jnp.zeros((B, H), jnp.float32)          # h0 = zeros, matches torch.zeros(...)
    h2 = jnp.zeros((B, H), jnp.float32)

    # T is small and static: fully unroll so every slice is static and the LLO scheduler
    # can interleave adjacent timesteps' MXU / EUP / VPU work.  Per step: 2 dots total.
    for t in range(T):
        # Layer 0: LHS = [h1_{t-1} | x_t]; h1 (late operand) stays at lanes [0,H).
        h1 = cell(jnp.concatenate([h1, x[:, t, :]], axis=1), w0, b0, h1)
        # nn.GRU dropout(p=0.1) between layers is identity in eval/inference.
        # Layer 1: LHS = [h1_t | h2_{t-1}]; h1_t (late operand) stays at lanes [0,H).
        h2 = cell(jnp.concatenate([h1, h2], axis=1), w1, b1, h2)

    # Linear head on the last timestep of the top layer: y = h2_T @ wl + bl.
    # Computed as a lane-masked mul + XLU lane reduction (wl stored as a slab row).
    out_ref[...] = jnp.sum(h2 * wl, axis=1, keepdims=True) + bl


# ----------------------------------------------------------------------------------
# One-time parameter fusion (model-load time, NOT on the per-call path)
# ----------------------------------------------------------------------------------
def fuse_params(params, dtype=jnp.float32):
    """Pack all TSModelGRU parameters into one VMEM slab + one SMEM scalar.

    Slab layout (f32, LN = max(128, 4H) lanes, all row offsets sublane-aligned):
      rows [0, H)          : layer-0 hidden-side weight  [wh0_r | wh0_z |   0   | wh0_n]
      rows [H, H+F)        : layer-0 input-side weight   [wi0_r | wi0_z | wi0_n |   0  ]
      rows [H+F, H+Fp)     : zero padding
      rows [H+Fp, 3H+Fp)   : layer-1 fused weight        rows [0,H)=wi1 side, [H,2H)=wh1 side
      rows [3H+Fp, +8)     : row 0: b0 = [bi0_rz+bh0_rz | bi0_n | bh0_n]
                             row 1: b1 = [bi1_rz+bh1_rz | bi1_n | bh1_n]
                             row 2: linear-head weight as a row (lanes [0,H))
                             rows 3..7: zero padding
    """
    wi0, wh0, bi0, bh0 = params["wi0"], params["wh0"], params["bi0"], params["bh0"]
    wi1, wh1, bi1, bh1 = params["wi1"], params["wh1"], params["bi1"], params["bh1"]
    H = wh0.shape[2]
    F = wi0.shape[1]
    assert H % 8 == 0, "n_hidden must be a multiple of 8 (sublane tile)"
    LN = max(128, 4 * H)
    assert 4 * H <= LN  # TODO(synk): tile the 4H gate axis over lanes if n_hidden > 32
    Fp = ((F + 7) // 8) * 8
    zHH = jnp.zeros((H, H), jnp.float32)
    zFH = jnp.zeros((F, H), jnp.float32)

    def rows(blocks):
        m = jnp.concatenate(blocks, axis=1)
        return jnp.pad(m, ((0, 0), (0, LN - m.shape[1])))

    w0 = jnp.concatenate(
        [rows([wh0[0], wh0[1], zHH, wh0[2]]),          # h1 side
         rows([wi0[0], wi0[1], wi0[2], zFH]),          # x side
         jnp.zeros((Fp - F, LN), jnp.float32)], axis=0)
    w1 = jnp.concatenate(
        [rows([wi1[0], wi1[1], wi1[2], zHH]),          # h1 (lower-layer input) side
         rows([wh1[0], wh1[1], zHH, wh1[2]])], axis=0) # h2 (recurrent) side
    b0 = rows([bi0[0] + bh0[0], bi0[1] + bh0[1], bi0[2], bh0[2]])
    b1 = rows([bi1[0] + bh1[0], bi1[1] + bh1[1], bi1[2], bh1[2]])
    wl_row = jnp.pad(params["wl"].T, ((0, 0), (0, LN - H)))
    tail = jnp.concatenate([b0, b1, wl_row, jnp.zeros((5, LN), jnp.float32)], axis=0)

    slab = jnp.concatenate([w0, w1, tail], axis=0).astype(dtype)    # (3H + Fp + 8, LN)
    bl = params["bl"].reshape(1, 1).astype(jnp.float32)
    return {"slab": slab, "bl": bl, "n_features": F, "n_hidden": H}


def make_ts_model_gru(params):
    """Build the jitted forward pass.  Parameter fusion runs exactly once, here."""
    fused = fuse_params(params)
    F, H = fused["n_features"], fused["n_hidden"]
    slab, bl = fused["slab"], fused["bl"]

    kernel = functools.partial(_gru_head_kernel, n_features=F, n_hidden=H)
    vmem = pl.BlockSpec(memory_space=pltpu.MemorySpace.VMEM)
    smem = pl.BlockSpec(memory_space=pltpu.MemorySpace.SMEM)

    @jax.jit
    def forward(x_btf):
        """x_btf: (B, T, F) batch-first float32 (raw PyTorch layout). Returns (B, 1) f32."""
        B = x_btf.shape[0]
        # Single grid-less call: x + slab + out are tens of KiB vs the 32 MiB scoped
        # VMEM default on every generation, so no tiling is needed.
        # Scaling guards (not needed at these toy shapes):
        #   * batch many independent series per call (B >= 64, multiple of 8): extra
        #     sublanes ride the same 2*T serial dot chain nearly for free;
        #   * v7x: add a leading batch-group grid axis with
        #     dimension_semantics=("parallel",) to use both TensorCores, and budget
        #     against its 64 MiB physical / 32 MiB scoped VMEM (set vmem_limit_bytes);
        #   * v5e (optional): stage the two fused RHS weights with matmul_push_rhs to
        #     avoid re-pushing them every step;
        #   * once batch >> 128, emit a lane-dense output instead of this (B, 1) column.
        return pl.pallas_call(
            kernel,
            out_shape=jax.ShapeDtypeStruct((B, 1), jnp.float32),
            in_specs=[vmem, vmem, smem],
            out_specs=vmem,
        )(x_btf, slab, bl)

    return forward


# ----------------------------------------------------------------------------------
# Deterministic init + pure-JAX reference (PyTorch GRU semantics)
# ----------------------------------------------------------------------------------
def init_params(key, n_features, n_hidden):
    """PyTorch-shaped GRU/Linear params, uniform(-1/sqrt(H), 1/sqrt(H)); gate order r,z,n.
    wi: (3, in, H)   wh: (3, H, H)   bi/bh: (3, 1, H)   wl: (H, 1)   bl: (1, 1)."""
    H, F = n_hidden, n_features
    k = 1.0 / jnp.sqrt(jnp.float32(H))
    keys = jax.random.split(key, 10)

    def u(kk, shape):
        return jax.random.uniform(kk, shape, jnp.float32, minval=-k, maxval=k)

    return dict(
        wi0=u(keys[0], (3, F, H)), wh0=u(keys[1], (3, H, H)),
        bi0=u(keys[2], (3, 1, H)), bh0=u(keys[3], (3, 1, H)),
        wi1=u(keys[4], (3, H, H)), wh1=u(keys[5], (3, H, H)),
        bi1=u(keys[6], (3, 1, H)), bh1=u(keys[7], (3, 1, H)),
        wl=u(keys[8], (H, 1)),     bl=u(keys[9], (1, 1)),
    )


def reference_forward(x_btf, params):
    """Pure-JAX f32 reference of the same forward pass (eval mode)."""
    B, T, F = x_btf.shape
    H = params["wh0"].shape[2]

    def cell(xt, h, wi, wh, bi, bh):
        r = jax.nn.sigmoid(xt @ wi[0] + bi[0] + h @ wh[0] + bh[0])
        z = jax.nn.sigmoid(xt @ wi[1] + bi[1] + h @ wh[1] + bh[1])
        n = jnp.tanh(xt @ wi[2] + bi[2] + r * (h @ wh[2] + bh[2]))
        return (1.0 - z) * n + z * h

    h1 = jnp.zeros((B, H), jnp.float32)
    h2 = jnp.zeros((B, H), jnp.float32)
    for t in range(T):
        xt = x_btf[:, t, :]
        h1 = cell(xt, h1, params["wi0"], params["wh0"], params["bi0"], params["bh0"])
        h2 = cell(h1, h2, params["wi1"], params["wh1"], params["bi1"], params["bh1"])
    return h2 @ params["wl"] + params["bl"]


if __name__ == "__main__":
    B, T, F, H = 2, 8, 4, 32  # batch, seq, n_features, n_hidden (n_layers=2)

    key = jax.random.PRNGKey(0)
    kx, kp = jax.random.split(key)
    x = jax.random.normal(kx, (B, T, F), dtype=jnp.float32)   # batch_first, like PyTorch
    params = init_params(kp, n_features=F, n_hidden=H)

    forward = make_ts_model_gru(params)                        # params fused once, here
    y = jax.block_until_ready(forward(x))
    y_ref = reference_forward(x, params)

    assert y.shape == (B, 1)
    assert jnp.allclose(y, y_ref, atol=1e-4, rtol=1e-4), (y, y_ref)

    print("KERNEL_OK")
</pallas_src>

<mosaic_0001>
module attributes {stable_mosaic.version = 11 : i64} {
  func.func @_gru_head_kernel(%arg0: memref<2x8x4xf32, #tpu.memory_space<vmem>>, %arg1: memref<112x128xf32, #tpu.memory_space<vmem>>, %arg2: memref<1x1xf32, #tpu.memory_space<smem>>, %arg3: memref<2x1xf32, #tpu.memory_space<vmem>>) attributes {dimension_semantics = [], scalar_prefetch = 0 : i64, scratch_operands = 0 : i64, tpu.core_type = #tpu.core_type<tc>} {
    %c0 = arith.constant 0 : index
    %c0_0 = arith.constant 0 : index
    %0 = vector.load %arg1[%c0, %c0_0] : memref<112x128xf32, #tpu.memory_space<vmem>>, vector<36x128xf32>
    %c40 = arith.constant 40 : index
    %c0_1 = arith.constant 0 : index
    %1 = vector.load %arg1[%c40, %c0_1] : memref<112x128xf32, #tpu.memory_space<vmem>>, vector<64x128xf32>
    %c104 = arith.constant 104 : index
    %c0_2 = arith.constant 0 : index
    %2 = vector.load %arg1[%c104, %c0_2] : memref<112x128xf32, #tpu.memory_space<vmem>>, vector<1x128xf32>
    %3 = vector.shape_cast %2 : vector<1x128xf32> to vector<1x128xf32>
    %4 = vector.broadcast %3 : vector<1x128xf32> to vector<2x128xf32>
    %c105 = arith.constant 105 : index
    %c0_3 = arith.constant 0 : index
    %5 = vector.load %arg1[%c105, %c0_3] : memref<112x128xf32, #tpu.memory_space<vmem>>, vector<1x128xf32>
    %6 = vector.shape_cast %5 : vector<1x128xf32> to vector<1x128xf32>
    %7 = vector.broadcast %6 : vector<1x128xf32> to vector<2x128xf32>
    %c106 = arith.constant 106 : index
    %c0_4 = arith.constant 0 : index
    %8 = vector.load %arg1[%c106, %c0_4] : memref<112x128xf32, #tpu.memory_space<vmem>>, vector<1x32xf32>
    %9 = vector.shape_cast %8 : vector<1x32xf32> to vector<1x32xf32>
    %10 = vector.broadcast %9 : vector<1x32xf32> to vector<2x32xf32>
    %c0_5 = arith.constant 0 : index
    %c0_6 = arith.constant 0 : index
    %11 = memref.load %arg2[%c0_5, %c0_6] : memref<1x1xf32, #tpu.memory_space<smem>>
    %c0_7 = arith.constant 0 : index
    %c0_8 = arith.constant 0 : index
    %c0_9 = arith.constant 0 : index
    %12 = vector.load %arg0[%c0_7, %c0_8, %c0_9] : memref<2x8x4xf32, #tpu.memory_space<vmem>>, vector<2x8x4xf32>
    %cst = arith.constant 0.000000e+00 : f32
    %13 = vector.broadcast %cst : f32 to vector<2x32xf32>
    %cst_10 = arith.constant 0.000000e+00 : f32
    %14 = vector.broadcast %cst_10 : f32 to vector<2x32xf32>
    %15 = vector.extract_strided_slice %12 {offsets = [0, 0, 0], sizes = [2, 1, 4], strides = [1, 1, 1]} : vector<2x8x4xf32> to vector<2x1x4xf32>
    %16 = vector.shape_cast %15 : vector<2x1x4xf32> to vector<2x4xf32>
    %17 = tpu.concatenate %13, %16 in 1 : vector<2x32xf32>, vector<2x4xf32> -> vector<2x36xf32>
    %cst_11 = arith.constant dense<0.000000e+00> : vector<2x128xf32>
    %18 = tpu.matmul %17, %0, %cst_11 {dimension_numbers = #tpu.dot_dimension_numbers<[1], [0], [0], [1], [0, 0, 1, 1], [], []>} : vector<2x36xf32>, vector<36x128xf32>, vector<2x128xf32> -> vector<2x128xf32>
    %19 = arith.addf %18, %4 : vector<2x128xf32>
    %20 = vector.extract_strided_slice %19 {offsets = [0, 0], sizes = [2, 64], strides = [1, 1]} : vector<2x128xf32> to vector<2x64xf32>
    %21 = arith.negf %20 : vector<2x64xf32>
    %22 = math.exp %21 : vector<2x64xf32>
    %cst_12 = arith.constant 1.000000e+00 : f32
    %23 = vector.broadcast %cst_12 : f32 to vector<2x64xf32>
    %24 = arith.addf %23, %22 : vector<2x64xf32>
    %25 = arith.divf %23, %24 : vector<2x64xf32>
    %26 = vector.extract_strided_slice %25 {offsets = [0, 0], sizes = [2, 32], strides = [1, 1]} : vector<2x64xf32> to vector<2x32xf32>
    %27 = vector.extract_strided_slice %25 {offsets = [0, 32], sizes = [2, 32], strides = [1, 1]} : vector<2x64xf32> to vector<2x32xf32>
    %28 = vector.extract_strided_slice %19 {offsets = [0, 64], sizes = [2, 32], strides = [1, 1]} : vector<2x128xf32> to vector<2x32xf32>
    %29 = vector.extract_strided_slice %19 {offsets = [0, 96], sizes = [2, 32], strides = [1, 1]} : vector<2x128xf32> to vector<2x32xf32>
    %30 = arith.mulf %26, %29 : vector<2x32xf32>
    %31 = arith.addf %28, %30 : vector<2x32xf32>
    %32 = math.tanh %31 : vector<2x32xf32>
    %cst_13 = arith.constant 1.000000e+00 : f32
    %33 = vector.broadcast %cst_13 : f32 to vector<2x32xf32>
    %34 = arith.subf %33, %27 : vector<2x32xf32>
    %35 = arith.mulf %34, %32 : vector<2x32xf32>
    %36 = arith.mulf %27, %13 : vector<2x32xf32>
    %37 = arith.addf %35, %36 : vector<2x32xf32>
    %38 = tpu.concatenate %37, %14 in 1 : vector<2x32xf32>, vector<2x32xf32> -> vector<2x64xf32>
    %cst_14 = arith.constant dense<0.000000e+00> : vector<2x128xf32>
    %39 = tpu.matmul %38, %1, %cst_14 {dimension_numbers = #tpu.dot_dimension_numbers<[1], [0], [0], [1], [0, 0, 1, 1], [], []>} : vector<2x64xf32>, vector<64x128xf32>, vector<2x128xf32> -> vector<2x128xf32>
    %40 = arith.addf %39, %7 : vector<2x128xf32>
    %41 = vector.extract_strided_slice %40 {offsets = [0, 0], sizes = [2, 64], strides = [1, 1]} : vector<2x128xf32> to vector<2x64xf32>
    %42 = arith.negf %41 : vector<2x64xf32>
    %43 = math.exp %42 : vector<2x64xf32>
    %cst_15 = arith.constant 1.000000e+00 : f32
    %44 = vector.broadcast %cst_15 : f32 to vector<2x64xf32>
    %45 = arith.addf %44, %43 : vector<2x64xf32>
    %46 = arith.divf %44, %45 : vector<2x64xf32>
    %47 = vector.extract_strided_slice %46 {offsets = [0, 0], sizes = [2, 32], strides = [1, 1]} : vector<2x64xf32> to vector<2x32xf32>
    %48 = vector.extract_strided_slice %46 {offsets = [0, 32], sizes = [2, 32], strides = [1, 1]} : vector<2x64xf32> to vector<2x32xf32>
    %49 = vector.extract_strided_slice %40 {offsets = [0, 64], sizes = [2, 32], strides = [1, 1]} : vector<2x128xf32> to vector<2x32xf32>
    %50 = vector.extract_strided_slice %40 {offsets = [0, 96], sizes = [2, 32], strides = [1, 1]} : vector<2x128xf32> to vector<2x32xf32>
    %51 = arith.mulf %47, %50 : vector<2x32xf32>
    %52 = arith.addf %49, %51 : vector<2x32xf32>
    %53 = math.tanh %52 : vector<2x32xf32>
    %cst_16 = arith.constant 1.000000e+00 : f32
    %54 = vector.broadcast %cst_16 : f32 to vector<2x32xf32>
    %55 = arith.subf %54, %48 : vector<2x32xf32>
    %56 = arith.mulf %55, %53 : vector<2x32xf32>
    %57 = arith.mulf %48, %14 : vector<2x32xf32>
    %58 = arith.addf %56, %57 : vector<2x32xf32>
    %59 = vector.extract_strided_slice %12 {offsets = [0, 1, 0], sizes = [2, 1, 4], strides = [1, 1, 1]} : vector<2x8x4xf32> to vector<2x1x4xf32>
    %60 = vector.shape_cast %59 : vector<2x1x4xf32> to vector<2x4xf32>
    %61 = tpu.concatenate %37, %60 in 1 : vector<2x32xf32>, vector<2x4xf32> -> vector<2x36xf32>
    %cst_17 = arith.constant dense<0.000000e+00> : vector<2x128xf32>
    %62 = tpu.matmul %61, %0, %cst_17 {dimension_numbers = #tpu.dot_dimension_numbers<[1], [0], [0], [1], [0, 0, 1, 1], [], []>} : vector<2x36xf32>, vector<36x128xf32>, vector<2x128xf32> -> vector<2x128xf32>
    %63 = arith.addf %62, %4 : vector<2x128xf32>
    %64 = vector.extract_strided_slice %63 {offsets = [0, 0], sizes = [2, 64], strides = [1, 1]} : vector<2x128xf32> to vector<2x64xf32>
    %65 = arith.negf %64 : vector<2x64xf32>
    %66 = math.exp %65 : vector<2x64xf32>
    %cst_18 = arith.constant 1.000000e+00 : f32
    %67 = vector.broadcast %cst_18 : f32 to vector<2x64xf32>
    %68 = arith.addf %67, %66 : vector<2x64xf32>
    %69 = arith.divf %67, %68 : vector<2x64xf32>
    %70 = vector.extract_strided_slice %69 {offsets = [0, 0], sizes = [2, 32], strides = [1, 1]} : vector<2x64xf32> to vector<2x32xf32>
    %71 = vector.extract_strided_slice %69 {offsets = [0, 32], sizes = [2, 32], strides = [1, 1]} : vector<2x64xf32> to vector<2x32xf32>
    %72 = vector.extract_strided_slice %63 {offsets = [0, 64], sizes = [2, 32], strides = [1, 1]} : vector<2x128xf32> to vector<2x32xf32>
    %73 = vector.extract_strided_slice %63 {offsets = [0, 96], sizes = [2, 32], strides = [1, 1]} : vector<2x128xf32> to vector<2x32xf32>
    %74 = arith.mulf %70, %73 : vector<2x32xf32>
    %75 = arith.addf %72, %74 : vector<2x32xf32>
    %76 = math.tanh %75 : vector<2x32xf32>
    %cst_19 = arith.constant 1.000000e+00 : f32
    %77 = vector.broadcast %cst_19 : f32 to vector<2x32xf32>
    %78 = arith.subf %77, %71 : vector<2x32xf32>
    %79 = arith.mulf %78, %76 : vector<2x32xf32>
    %80 = arith.mulf %71, %37 : vector<2x32xf32>
    %81 = arith.addf %79, %80 : vector<2x32xf32>
    %82 = tpu.concatenate %81, %58 in 1 : vector<2x32xf32>, vector<2x32xf32> -> vector<2x64xf32>
    %cst_20 = arith.constant dense<0.000000e+00> : vector<2x128xf32>
    %83 = tpu.matmul %82, %1, %cst_20 {dimension_numbers = #tpu.dot_dimension_numbers<[1], [0], [0], [1], [0, 0, 1, 1], [], []>} : vector<2x64xf32>, vector<64x128xf32>, vector<2x128xf32> -> vector<2x128xf32>
    %84 = arith.addf %83, %7 : vector<2x128xf32>
    %85 = vector.extract_strided_slice %84 {offsets = [0, 0], sizes = [2, 64], strides = [1, 1]} : vector<2x128xf32> to vector<2x64xf32>
    %86 = arith.negf %85 : vector<2x64xf32>
    %87 = math.exp %86 : vector<2x64xf32>
    %cst_21 = arith.constant 1.000000e+00 : f32
    %88 = vector.broadcast %cst_21 : f32 to vector<2x64xf32>
    %89 = arith.addf %88, %87 : vector<2x64xf32>
    %90 = arith.divf %88, %89 : vector<2x64xf32>
    %91 = vector.extract_strided_slice %90 {offsets = [0, 0], sizes = [2, 32], strides = [1, 1]} : vector<2x64xf32> to vector<2x32xf32>
    %92 = vector.extract_strided_slice %90 {offsets = [0, 32], sizes = [2, 32], strides = [1, 1]} : vector<2x64xf32> to vector<2x32xf32>
    %93 = vector.extract_strided_slice %84 {offsets = [0, 64], sizes = [2, 32], strides = [1, 1]} : vector<2x128xf32> to vector<2x32xf32>
    %94 = vector.extract_strided_slice %84 {offsets = [0, 96], sizes = [2, 32], strides = [1, 1]} : vector<2x128xf32> to vector<2x32xf32>
    %95 = arith.mulf %91, %94 : vector<2x32xf32>
    %96 = arith.addf %93, %95 : vector<2x32xf32>
    %97 = math.tanh %96 : vector<2x32xf32>
    %cst_22 = arith.constant 1.000000e+00 : f32
    %98 = vector.broadcast %cst_22 : f32 to vector<2x32xf32>
    %99 = arith.subf %98, %92 : vector<2x32xf32>
    %100 = arith.mulf %99, %97 : vector<2x32xf32>
    %101 = arith.mulf %92, %58 : vector<2x32xf32>
    %102 = arith.addf %100, %101 : vector<2x32xf32>
    %103 = vector.extract_strided_slice %12 {offsets = [0, 2, 0], sizes = [2, 1, 4], strides = [1, 1, 1]} : vector<2x8x4xf32> to vector<2x1x4xf32>
    %104 = vector.shape_cast %103 : vector<2x1x4xf32> to vector<2x4xf32>
    %105 = tpu.concatenate %81, %104 in 1 : vector<2x32xf32>, vector<2x4xf32> -> vector<2x36xf32>
    %cst_23 = arith.constant dense<0.000000e+00> : vector<2x128xf32>
    %106 = tpu.matmul %105, %0, %cst_23 {dimension_numbers = #tpu.dot_dimension_numbers<[1], [0], [0], [1], [0, 0, 1, 1], [], []>} : vector<2x36xf32>, vector<36x128xf32>, vector<2x128xf32> -> vector<2x128xf32>
    %107 = arith.addf %106, %4 : vector<2x128xf32>
    %108 = vector.extract_strided_slice %107 {offsets = [0, 0], sizes = [2, 64], strides = [1, 1]} : vector<2x128xf32> to vector<2x64xf32>
    %109 = arith.negf %108 : vector<2x64xf32>
    %110 = math.exp %109 : vector<2x64xf32>
    %cst_24 = arith.constant 1.000000e+00 : f32
    %111 = vector.broadcast %cst_24 : f32 to vector<2x64xf32>
    %112 = arith.addf %111, %110 : vector<2x64xf32>
    %113 = arith.divf %111, %112 : vector<2x64xf32>
    %114 = vector.extract_strided_slice %113 {offsets = [0, 0], sizes = [2, 32], strides = [1, 1]} : vector<2x64xf32> to vector<2x32xf32>
    %115 = vector.extract_strided_slice %113 {offsets = [0, 32], sizes = [2, 32], strides = [1, 1]} : vector<2x64xf32> to vector<2x32xf32>
    %116 = vector.extract_strided_slice %107 {offsets = [0, 64], sizes = [2, 32], strides = [1, 1]} : vector<2x128xf32> to vector<2x32xf32>
    %117 = vector.extract_strided_slice %107 {offsets = [0, 96], sizes = [2, 32], strides = [1, 1]} : vector<2x128xf32> to vector<2x32xf32>
    %118 = arith.mulf %114, %117 : vector<2x32xf32>
    %119 = arith.addf %116, %118 : vector<2x32xf32>
    %120 = math.tanh %119 : vector<2x32xf32>
    %cst_25 = arith.constant 1.000000e+00 : f32
    %121 = vector.broadcast %cst_25 : f32 to vector<2x32xf32>
    %122 = arith.subf %121, %115 : vector<2x32xf32>
    %123 = arith.mulf %122, %120 : vector<2x32xf32>
    %124 = arith.mulf %115, %81 : vector<2x32xf32>
    %125 = arith.addf %123, %124 : vector<2x32xf32>
    %126 = tpu.concatenate %125, %102 in 1 : vector<2x32xf32>, vector<2x32xf32> -> vector<2x64xf32>
    %cst_26 = arith.constant dense<0.000000e+00> : vector<2x128xf32>
    %127 = tpu.matmul %126, %1, %cst_26 {dimension_numbers = #tpu.dot_dimension_numbers<[1], [0], [0], [1], [0, 0, 1, 1], [], []>} : vector<2x64xf32>, vector<64x128xf32>, vector<2x128xf32> -> vector<2x128xf32>
    %128 = arith.addf %127, %7 : vector<2x128xf32>
    %129 = vector.extract_strided_slice %128 {offsets = [0, 0], sizes = [2, 64], strides = [1, 1]} : vector<2x128xf32> to vector<2x64xf32>
    %130 = arith.negf %129 : vector<2x64xf32>
    %131 = math.exp %130 : vector<2x64xf32>
    %cst_27 = arith.constant 1.000000e+00 : f32
    %132 = vector.broadcast %cst_27 : f32 to vector<2x64xf32>
    %133 = arith.addf %132, %131 : vector<2x64xf32>
    %134 = arith.divf %132, %133 : vector<2x64xf32>
    %135 = vector.extract_strided_slice %134 {offsets = [0, 0], sizes = [2, 32], strides = [1, 1]} : vector<2x64xf32> to vector<2x32xf32>
    %136 = vector.extract_strided_slice %134 {offsets = [0, 32], sizes = [2, 32], strides = [1, 1]} : vector<2x64xf32> to vector<2x32xf32>
    %137 = vector.extract_strided_slice %128 {offsets = [0, 64], sizes = [2, 32], strides = [1, 1]} : vector<2x128xf32> to vector<2x32xf32>
    %138 = vector.extract_strided_slice %128 {offsets = [0, 96], sizes = [2, 32], strides = [1, 1]} : vector<2x128xf32> to vector<2x32xf32>
    %139 = arith.mulf %135, %138 : vector<2x32xf32>
    %140 = arith.addf %137, %139 : vector<2x32xf32>
    %141 = math.tanh %140 : vector<2x32xf32>
    %cst_28 = arith.constant 1.000000e+00 : f32
    %142 = vector.broadcast %cst_28 : f32 to vector<2x32xf32>
    %143 = arith.subf %142, %136 : vector<2x32xf32>
    %144 = arith.mulf %143, %141 : vector<2x32xf32>
    %145 = arith.mulf %136, %102 : vector<2x32xf32>
    %146 = arith.addf %144, %145 : vector<2x32xf32>
    %147 = vector.extract_strided_slice %12 {offsets = [0, 3, 0], sizes = [2, 1, 4], strides = [1, 1, 1]} : vector<2x8x4xf32> to vector<2x1x4xf32>
    %148 = vector.shape_cast %147 : vector<2x1x4xf32> to vector<2x4xf32>
    %149 = tpu.concatenate %125, %148 in 1 : vector<2x32xf32>, vector<2x4xf32> -> vector<2x36xf32>
    %cst_29 = arith.constant dense<0.000000e+00> : vector<2x128xf32>
    %150 = tpu.matmul %149, %0, %cst_29 {dimension_numbers = #tpu.dot_dimension_numbers<[1], [0], [0], [1], [0, 0, 1, 1], [], []>} : vector<2x36xf32>, vector<36x128xf32>, vector<2x128xf32> -> vector<2x128xf32>
    %151 = arith.addf %150, %4 : vector<2x128xf32>
    %152 = vector.extract_strided_slice %151 {offsets = [0, 0], sizes = [2, 64], strides = [1, 1]} : vector<2x128xf32> to vector<2x64xf32>
    %153 = arith.negf %152 : vector<2x64xf32>
    %154 = math.exp %153 : vector<2x64xf32>
    %cst_30 = arith.constant 1.000000e+00 : f32
    %155 = vector.broadcast %cst_30 : f32 to vector<2x64xf32>
    %156 = arith.addf %155, %154 : vector<2x64xf32>
    %157 = arith.divf %155, %156 : vector<2x64xf32>
    %158 = vector.extract_strided_slice %157 {offsets = [0, 0], sizes = [2, 32], strides = [1, 1]} : vector<2x64xf32> to vector<2x32xf32>
    %159 = vector.extract_strided_slice %157 {offsets = [0, 32], sizes = [2, 32], strides = [1, 1]} : vector<2x64xf32> to vector<2x32xf32>
    %160 = vector.extract_strided_slice %151 {offsets = [0, 64], sizes = [2, 32], strides = [1, 1]} : vector<2x128xf32> to vector<2x32xf32>
    %161 = vector.extract_strided_slice %151 {offsets = [0, 96], sizes = [2, 32], strides = [1, 1]} : vector<2x128xf32> to vector<2x32xf32>
    %162 = arith.mulf %158, %161 : vector<2x32xf32>
    %163 = arith.addf %160, %162 : vector<2x32xf32>
    %164 = math.tanh %163 : vector<2x32xf32>
    %cst_31 = arith.constant 1.000000e+00 : f32
    %165 = vector.broadcast %cst_31 : f32 to vector<2x32xf32>
    %166 = arith.subf %165, %159 : vector<2x32xf32>
    %167 = arith.mulf %166, %164 : vector<2x32xf32>
    %168 = arith.mulf %159, %125 : vector<2x32xf32>
    %169 = arith.addf %167, %168 : vector<2x32xf32>
    %170 = tpu.concatenate %169, %146 in 1 : vector<2x32xf32>, vector<2x32xf32> -> vector<2x64xf32>
    %cst_32 = arith.constant dense<0.000000e+00> : vector<2x128xf32>
    %171 = tpu.matmul %170, %1, %cst_32 {dimension_numbers = #tpu.dot_dimension_numbers<[1], [0], [0], [1], [0, 0, 1, 1], [], []>} : vector<2x64xf32>, vector<64x128xf32>, vector<2x128xf32> -> vector<2x128xf32>
    %172 = arith.addf %171, %7 : vector<2x128xf32>
    %173 = vector.extract_strided_slice %172 {offsets = [0, 0], sizes = [2, 64], strides = [1, 1]} : vector<2x128xf32> to vector<2x64xf32>
    %174 = arith.negf %173 : vector<2x64xf32>
    %175 = math.exp %174 : vector<2x64xf32>
    %cst_33 = arith.constant 1.000000e+00 : f32
    %176 = vector.broadcast %cst_33 : f32 to vector<2x64xf32>
    %177 = arith.addf %176, %175 : vector<2x64xf32>
    %178 = arith.divf %176, %177 : vector<2x64xf32>
    %179 = vector.extract_strided_slice %178 {offsets = [0, 0], sizes = [2, 32], strides = [1, 1]} : vector<2x64xf32> to vector<2x32xf32>
    %180 = vector.extract_strided_slice %178 {offsets = [0, 32], sizes = [2, 32], strides = [1, 1]} : vector<2x64xf32> to vector<2x32xf32>
    %181 = vector.extract_strided_slice %172 {offsets = [0, 64], sizes = [2, 32], strides = [1, 1]} : vector<2x128xf32> to vector<2x32xf32>
    %182 = vector.extract_strided_slice %172 {offsets = [0, 96], sizes = [2, 32], strides = [1, 1]} : vector<2x128xf32> to vector<2x32xf32>
    %183 = arith.mulf %179, %182 : vector<2x32xf32>
    %184 = arith.addf %181, %183 : vector<2x32xf32>
    %185 = math.tanh %184 : vector<2x32xf32>
    %cst_34 = arith.constant 1.000000e+00 : f32
    %186 = vector.broadcast %cst_34 : f32 to vector<2x32xf32>
    %187 = arith.subf %186, %180 : vector<2x32xf32>
    %188 = arith.mulf %187, %185 : vector<2x32xf32>
    %189 = arith.mulf %180, %146 : vector<2x32xf32>
    %190 = arith.addf %188, %189 : vector<2x32xf32>
    %191 = vector.extract_strided_slice %12 {offsets = [0, 4, 0], sizes = [2, 1, 4], strides = [1, 1, 1]} : vector<2x8x4xf32> to vector<2x1x4xf32>
    %192 = vector.shape_cast %191 : vector<2x1x4xf32> to vector<2x4xf32>
    %193 = tpu.concatenate %169, %192 in 1 : vector<2x32xf32>, vector<2x4xf32> -> vector<2x36xf32>
    %cst_35 = arith.constant dense<0.000000e+00> : vector<2x128xf32>
    %194 = tpu.matmul %193, %0, %cst_35 {dimension_numbers = #tpu.dot_dimension_numbers<[1], [0], [0], [1], [0, 0, 1, 1], [], []>} : vector<2x36xf32>, vector<36x128xf32>, vector<2x128xf32> -> vector<2x128xf32>
    %195 = arith.addf %194, %4 : vector<2x128xf32>
    %196 = vector.extract_strided_slice %195 {offsets = [0, 0], sizes = [2, 64], strides = [1, 1]} : vector<2x128xf32> to vector<2x64xf32>
    %197 = arith.negf %196 : vector<2x64xf32>
    %198 = math.exp %197 : vector<2x64xf32>
    %cst_36 = arith.constant 1.000000e+00 : f32
    %199 = vector.broadcast %cst_36 : f32 to vector<2x64xf32>
    %200 = arith.addf %199, %198 : vector<2x64xf32>
    %201 = arith.divf %199, %200 : vector<2x64xf32>
    %202 = vector.extract_strided_slice %201 {offsets = [0, 0], sizes = [2, 32], strides = [1, 1]} : vector<2x64xf32> to vector<2x32xf32>
    %203 = vector.extract_strided_slice %201 {offsets = [0, 32], sizes = [2, 32], strides = [1, 1]} : vector<2x64xf32> to vector<2x32xf32>
    %204 = vector.extract_strided_slice %195 {offsets = [0, 64], sizes = [2, 32], strides = [1, 1]} : vector<2x128xf32> to vector<2x32xf32>
    %205 = vector.extract_strided_slice %195 {offsets = [0, 96], sizes = [2, 32], strides = [1, 1]} : vector<2x128xf32> to vector<2x32xf32>
    %206 = arith.mulf %202, %205 : vector<2x32xf32>
    %207 = arith.addf %204, %206 : vector<2x32xf32>
    %208 = math.tanh %207 : vector<2x32xf32>
    %cst_37 = arith.constant 1.000000e+00 : f32
    %209 = vector.broadcast %cst_37 : f32 to vector<2x32xf32>
    %210 = arith.subf %209, %203 : vector<2x32xf32>
    %211 = arith.mulf %210, %208 : vector<2x32xf32>
    %212 = arith.mulf %203, %169 : vector<2x32xf32>
    %213 = arith.addf %211, %212 : vector<2x32xf32>
    %214 = tpu.concatenate %213, %190 in 1 : vector<2x32xf32>, vector<2x32xf32> -> vector<2x64xf32>
    %cst_38 = arith.constant dense<0.000000e+00> : vector<2x128xf32>
    %215 = tpu.matmul %214, %1, %cst_38 {dimension_numbers = #tpu.dot_dimension_numbers<[1], [0], [0], [1], [0, 0, 1, 1], [], []>} : vector<2x64xf32>, vector<64x128xf32>, vector<2x128xf32> -> vector<2x128xf32>
    %216 = arith.addf %215, %7 : vector<2x128xf32>
    %217 = vector.extract_strided_slice %216 {offsets = [0, 0], sizes = [2, 64], strides = [1, 1]} : vector<2x128xf32> to vector<2x64xf32>
    %218 = arith.negf %217 : vector<2x64xf32>
    %219 = math.exp %218 : vector<2x64xf32>
    %cst_39 = arith.constant 1.000000e+00 : f32
    %220 = vector.broadcast %cst_39 : f32 to vector<2x64xf32>
    %221 = arith.addf %220, %219 : vector<2x64xf32>
    %222 = arith.divf %220, %221 : vector<2x64xf32>
    %223 = vector.extract_strided_slice %222 {offsets = [0, 0], sizes = [2, 32], strides = [1, 1]} : vector<2x64xf32> to vector<2x32xf32>
    %224 = vector.extract_strided_slice %222 {offsets = [0, 32], sizes = [2, 32], strides = [1, 1]} : vector<2x64xf32> to vector<2x32xf32>
    %225 = vector.extract_strided_slice %216 {offsets = [0, 64], sizes = [2, 32], strides = [1, 1]} : vector<2x128xf32> to vector<2x32xf32>
    %226 = vector.extract_strided_slice %216 {offsets = [0, 96], sizes = [2, 32], strides = [1, 1]} : vector<2x128xf32> to vector<2x32xf32>
    %227 = arith.mulf %223, %226 : vector<2x32xf32>
    %228 = arith.addf %225, %227 : vector<2x32xf32>
    %229 = math.tanh %228 : vector<2x32xf32>
    %cst_40 = arith.constant 1.000000e+00 : f32
    %230 = vector.broadcast %cst_40 : f32 to vector<2x32xf32>
    %231 = arith.subf %230, %224 : vector<2x32xf32>
    %232 = arith.mulf %231, %229 : vector<2x32xf32>
    %233 = arith.mulf %224, %190 : vector<2x32xf32>
    %234 = arith.addf %232, %233 : vector<2x32xf32>
    %235 = vector.extract_strided_slice %12 {offsets = [0, 5, 0], sizes = [2, 1, 4], strides = [1, 1, 1]} : vector<2x8x4xf32> to vector<2x1x4xf32>
    %236 = vector.shape_cast %235 : vector<2x1x4xf32> to vector<2x4xf32>
    %237 = tpu.concatenate %213, %236 in 1 : vector<2x32xf32>, vector<2x4xf32> -> vector<2x36xf32>
    %cst_41 = arith.constant dense<0.000000e+00> : vector<2x128xf32>
    %238 = tpu.matmul %237, %0, %cst_41 {dimension_numbers = #tpu.dot_dimension_numbers<[1], [0], [0], [1], [0, 0, 1, 1], [], []>} : vector<2x36xf32>, vector<36x128xf32>, vector<2x128xf32> -> vector<2x128xf32>
    %239 = arith.addf %238, %4 : vector<2x128xf32>
    %240 = vector.extract_strided_slice %239 {offsets = [0, 0], sizes = [2, 64], strides = [1, 1]} : vector<2x128xf32> to vector<2x64xf32>
    %241 = arith.negf %240 : vector<2x64xf32>
    %242 = math.exp %241 : vector<2x64xf32>
    %cst_42 = arith.constant 1.000000e+00 : f32
    %243 = vector.broadcast %cst_42 : f32 to vector<2x64xf32>
    %244 = arith.addf %243, %242 : vector<2x64xf32>
    %245 = arith.divf %243, %244 : vector<2x64xf32>
    %246 = vector.extract_strided_slice %245 {offsets = [0, 0], sizes = [2, 32], strides = [1, 1]} : vector<2x64xf32> to vector<2x32xf32>
    %247 = vector.extract_strided_slice %245 {offsets = [0, 32], sizes = [2, 32], strides = [1, 1]} : vector<2x64xf32> to vector<2x32xf32>
    %248 = vector.extract_strided_slice %239 {offsets = [0, 64], sizes = [2, 32], strides = [1, 1]} : vector<2x128xf32> to vector<2x32xf32>
    %249 = vector.extract_strided_slice %239 {offsets = [0, 96], sizes = [2, 32], strides = [1, 1]} : vector<2x128xf32> to vector<2x32xf32>
    %250 = arith.mulf %246, %249 : vector<2x32xf32>
    %251 = arith.addf %248, %250 : vector<2x32xf32>
    %252 = math.tanh %251 : vector<2x32xf32>
    %cst_43 = arith.constant 1.000000e+00 : f32
    %253 = vector.broadcast %cst_43 : f32 to vector<2x32xf32>
    %254 = arith.subf %253, %247 : vector<2x32xf32>
    %255 = arith.mulf %254, %252 : vector<2x32xf32>
    %256 = arith.mulf %247, %213 : vector<2x32xf32>
    %257 = arith.addf %255, %256 : vector<2x32xf32>
    %258 = tpu.concatenate %257, %234 in 1 : vector<2x32xf32>, vector<2x32xf32> -> vector<2x64xf32>
    %cst_44 = arith.constant dense<0.000000e+00> : vector<2x128xf32>
    %259 = tpu.matmul %258, %1, %cst_44 {dimension_numbers = #tpu.dot_dimension_numbers<[1], [0], [0], [1], [0, 0, 1, 1], [], []>} : vector<2x64xf32>, vector<64x128xf32>, vector<2x128xf32> -> vector<2x128xf32>
    %260 = arith.addf %259, %7 : vector<2x128xf32>
    %261 = vector.extract_strided_slice %260 {offsets = [0, 0], sizes = [2, 64], strides = [1, 1]} : vector<2x128xf32> to vector<2x64xf32>
    %262 = arith.negf %261 : vector<2x64xf32>
    %263 = math.exp %262 : vector<2x64xf32>
    %cst_45 = arith.constant 1.000000e+00 : f32
    %264 = vector.broadcast %cst_45 : f32 to vector<2x64xf32>
    %265 = arith.addf %264, %263 : vector<2x64xf32>
    %266 = arith.divf %264, %265 : vector<2x64xf32>
    %267 = vector.extract_strided_slice %266 {offsets = [0, 0], sizes = [2, 32], strides = [1, 1]} : vector<2x64xf32> to vector<2x32xf32>
    %268 = vector.extract_strided_slice %266 {offsets = [0, 32], sizes = [2, 32], strides = [1, 1]} : vector<2x64xf32> to vector<2x32xf32>
    %269 = vector.extract_strided_slice %260 {offsets = [0, 64], sizes = [2, 32], strides = [1, 1]} : vector<2x128xf32> to vector<2x32xf32>
    %270 = vector.extract_strided_slice %260 {offsets = [0, 96], sizes = [2, 32], strides = [1, 1]} : vector<2x128xf32> to vector<2x32xf32>
    %271 = arith.mulf %267, %270 : vector<2x32xf32>
    %272 = arith.addf %269, %271 : vector<2x32xf32>
    %273 = math.tanh %272 : vector<2x32xf32>
    %cst_46 = arith.constant 1.000000e+00 : f32
    %274 = vector.broadcast %cst_46 : f32 to vector<2x32xf32>
    %275 = arith.subf %274, %268 : vector<2x32xf32>
    %276 = arith.mulf %275, %273 : vector<2x32xf32>
    %277 = arith.mulf %268, %234 : vector<2x32xf32>
    %278 = arith.addf %276, %277 : vector<2x32xf32>
    %279 = vector.extract_strided_slice %12 {offsets = [0, 6, 0], sizes = [2, 1, 4], strides = [1, 1, 1]} : vector<2x8x4xf32> to vector<2x1x4xf32>
    %280 = vector.shape_cast %279 : vector<2x1x4xf32> to vector<2x4xf32>
    %281 = tpu.concatenate %257, %280 in 1 : vector<2x32xf32>, vector<2x4xf32> -> vector<2x36xf32>
    %cst_47 = arith.constant dense<0.000000e+00> : vector<2x128xf32>
    %282 = tpu.matmul %281, %0, %cst_47 {dimension_numbers = #tpu.dot_dimension_numbers<[1], [0], [0], [1], [0, 0, 1, 1], [], []>} : vector<2x36xf32>, vector<36x128xf32>, vector<2x128xf32> -> vector<2x128xf32>
    %283 = arith.addf %282, %4 : vector<2x128xf32>
    %284 = vector.extract_strided_slice %283 {offsets = [0, 0], sizes = [2, 64], strides = [1, 1]} : vector<2x128xf32> to vector<2x64xf32>
    %285 = arith.negf %284 : vector<2x64xf32>
    %286 = math.exp %285 : vector<2x64xf32>
    %cst_48 = arith.constant 1.000000e+00 : f32
    %287 = vector.broadcast %cst_48 : f32 to vector<2x64xf32>
    %288 = arith.addf %287, %286 : vector<2x64xf32>
    %289 = arith.divf %287, %288 : vector<2x64xf32>
    %290 = vector.extract_strided_slice %289 {offsets = [0, 0], sizes = [2, 32], strides = [1, 1]} : vector<2x64xf32> to vector<2x32xf32>
    %291 = vector.extract_strided_slice %289 {offsets = [0, 32], sizes = [2, 32], strides = [1, 1]} : vector<2x64xf32> to vector<2x32xf32>
    %292 = vector.extract_strided_slice %283 {offsets = [0, 64], sizes = [2, 32], strides = [1, 1]} : vector<2x128xf32> to vector<2x32xf32>
    %293 = vector.extract_strided_slice %283 {offsets = [0, 96], sizes = [2, 32], strides = [1, 1]} : vector<2x128xf32> to vector<2x32xf32>
    %294 = arith.mulf %290, %293 : vector<2x32xf32>
    %295 = arith.addf %292, %294 : vector<2x32xf32>
    %296 = math.tanh %295 : vector<2x32xf32>
    %cst_49 = arith.constant 1.000000e+00 : f32
    %297 = vector.broadcast %cst_49 : f32 to vector<2x32xf32>
    %298 = arith.subf %297, %291 : vector<2x32xf32>
    %299 = arith.mulf %298, %296 : vector<2x32xf32>
    %300 = arith.mulf %291, %257 : vector<2x32xf32>
    %301 = arith.addf %299, %300 : vector<2x32xf32>
    %302 = tpu.concatenate %301, %278 in 1 : vector<2x32xf32>, vector<2x32xf32> -> vector<2x64xf32>
    %cst_50 = arith.constant dense<0.000000e+00> : vector<2x128xf32>
    %303 = tpu.matmul %302, %1, %cst_50 {dimension_numbers = #tpu.dot_dimension_numbers<[1], [0], [0], [1], [0, 0, 1, 1], [], []>} : vector<2x64xf32>, vector<64x128xf32>, vector<2x128xf32> -> vector<2x128xf32>
    %304 = arith.addf %303, %7 : vector<2x128xf32>
    %305 = vector.extract_strided_slice %304 {offsets = [0, 0], sizes = [2, 64], strides = [1, 1]} : vector<2x128xf32> to vector<2x64xf32>
    %306 = arith.negf %305 : vector<2x64xf32>
    %307 = math.exp %306 : vector<2x64xf32>
    %cst_51 = arith.constant 1.000000e+00 : f32
    %308 = vector.broadcast %cst_51 : f32 to vector<2x64xf32>
    %309 = arith.addf %308, %307 : vector<2x64xf32>
    %310 = arith.divf %308, %309 : vector<2x64xf32>
    %311 = vector.extract_strided_slice %310 {offsets = [0, 0], sizes = [2, 32], strides = [1, 1]} : vector<2x64xf32> to vector<2x32xf32>
    %312 = vector.extract_strided_slice %310 {offsets = [0, 32], sizes = [2, 32], strides = [1, 1]} : vector<2x64xf32> to vector<2x32xf32>
    %313 = vector.extract_strided_slice %304 {offsets = [0, 64], sizes = [2, 32], strides = [1, 1]} : vector<2x128xf32> to vector<2x32xf32>
    %314 = vector.extract_strided_slice %304 {offsets = [0, 96], sizes = [2, 32], strides = [1, 1]} : vector<2x128xf32> to vector<2x32xf32>
    %315 = arith.mulf %311, %314 : vector<2x32xf32>
    %316 = arith.addf %313, %315 : vector<2x32xf32>
    %317 = math.tanh %316 : vector<2x32xf32>
    %cst_52 = arith.constant 1.000000e+00 : f32
    %318 = vector.broadcast %cst_52 : f32 to vector<2x32xf32>
    %319 = arith.subf %318, %312 : vector<2x32xf32>
    %320 = arith.mulf %319, %317 : vector<2x32xf32>
    %321 = arith.mulf %312, %278 : vector<2x32xf32>
    %322 = arith.addf %320, %321 : vector<2x32xf32>
    %323 = vector.extract_strided_slice %12 {offsets = [0, 7, 0], sizes = [2, 1, 4], strides = [1, 1, 1]} : vector<2x8x4xf32> to vector<2x1x4xf32>
    %324 = vector.shape_cast %323 : vector<2x1x4xf32> to vector<2x4xf32>
    %325 = tpu.concatenate %301, %324 in 1 : vector<2x32xf32>, vector<2x4xf32> -> vector<2x36xf32>
    %cst_53 = arith.constant dense<0.000000e+00> : vector<2x128xf32>
    %326 = tpu.matmul %325, %0, %cst_53 {dimension_numbers = #tpu.dot_dimension_numbers<[1], [0], [0], [1], [0, 0, 1, 1], [], []>} : vector<2x36xf32>, vector<36x128xf32>, vector<2x128xf32> -> vector<2x128xf32>
    %327 = arith.addf %326, %4 : vector<2x128xf32>
    %328 = vector.extract_strided_slice %327 {offsets = [0, 0], sizes = [2, 64], strides = [1, 1]} : vector<2x128xf32> to vector<2x64xf32>
    %329 = arith.negf %328 : vector<2x64xf32>
    %330 = math.exp %329 : vector<2x64xf32>
    %cst_54 = arith.constant 1.000000e+00 : f32
    %331 = vector.broadcast %cst_54 : f32 to vector<2x64xf32>
    %332 = arith.addf %331, %330 : vector<2x64xf32>
    %333 = arith.divf %331, %332 : vector<2x64xf32>
    %334 = vector.extract_strided_slice %333 {offsets = [0, 0], sizes = [2, 32], strides = [1, 1]} : vector<2x64xf32> to vector<2x32xf32>
    %335 = vector.extract_strided_slice %333 {offsets = [0, 32], sizes = [2, 32], strides = [1, 1]} : vector<2x64xf32> to vector<2x32xf32>
    %336 = vector.extract_strided_slice %327 {offsets = [0, 64], sizes = [2, 32], strides = [1, 1]} : vector<2x128xf32> to vector<2x32xf32>
    %337 = vector.extract_strided_slice %327 {offsets = [0, 96], sizes = [2, 32], strides = [1, 1]} : vector<2x128xf32> to vector<2x32xf32>
    %338 = arith.mulf %334, %337 : vector<2x32xf32>
    %339 = arith.addf %336, %338 : vector<2x32xf32>
    %340 = math.tanh %339 : vector<2x32xf32>
    %cst_55 = arith.constant 1.000000e+00 : f32
    %341 = vector.broadcast %cst_55 : f32 to vector<2x32xf32>
    %342 = arith.subf %341, %335 : vector<2x32xf32>
    %343 = arith.mulf %342, %340 : vector<2x32xf32>
    %344 = arith.mulf %335, %301 : vector<2x32xf32>
    %345 = arith.addf %343, %344 : vector<2x32xf32>
    %346 = tpu.concatenate %345, %322 in 1 : vector<2x32xf32>, vector<2x32xf32> -> vector<2x64xf32>
    %cst_56 = arith.constant dense<0.000000e+00> : vector<2x128xf32>
    %347 = tpu.matmul %346, %1, %cst_56 {dimension_numbers = #tpu.dot_dimension_numbers<[1], [0], [0], [1], [0, 0, 1, 1], [], []>} : vector<2x64xf32>, vector<64x128xf32>, vector<2x128xf32> -> vector<2x128xf32>
    %348 = arith.addf %347, %7 : vector<2x128xf32>
    %349 = vector.extract_strided_slice %348 {offsets = [0, 0], sizes = [2, 64], strides = [1, 1]} : vector<2x128xf32> to vector<2x64xf32>
    %350 = arith.negf %349 : vector<2x64xf32>
    %351 = math.exp %350 : vector<2x64xf32>
    %cst_57 = arith.constant 1.000000e+00 : f32
    %352 = vector.broadcast %cst_57 : f32 to vector<2x64xf32>
    %353 = arith.addf %352, %351 : vector<2x64xf32>
    %354 = arith.divf %352, %353 : vector<2x64xf32>
    %355 = vector.extract_strided_slice %354 {offsets = [0, 0], sizes = [2, 32], strides = [1, 1]} : vector<2x64xf32> to vector<2x32xf32>
    %356 = vector.extract_strided_slice %354 {offsets = [0, 32], sizes = [2, 32], strides = [1, 1]} : vector<2x64xf32> to vector<2x32xf32>
    %357 = vector.extract_strided_slice %348 {offsets = [0, 64], sizes = [2, 32], strides = [1, 1]} : vector<2x128xf32> to vector<2x32xf32>
    %358 = vector.extract_strided_slice %348 {offsets = [0, 96], sizes = [2, 32], strides = [1, 1]} : vector<2x128xf32> to vector<2x32xf32>
    %359 = arith.mulf %355, %358 : vector<2x32xf32>
    %360 = arith.addf %357, %359 : vector<2x32xf32>
    %361 = math.tanh %360 : vector<2x32xf32>
    %cst_58 = arith.constant 1.000000e+00 : f32
    %362 = vector.broadcast %cst_58 : f32 to vector<2x32xf32>
    %363 = arith.subf %362, %356 : vector<2x32xf32>
    %364 = arith.mulf %363, %361 : vector<2x32xf32>
    %365 = arith.mulf %356, %322 : vector<2x32xf32>
    %366 = arith.addf %364, %365 : vector<2x32xf32>
    %367 = arith.mulf %366, %10 : vector<2x32xf32>
    %cst_59 = arith.constant dense<0.000000e+00> : vector<2xf32>
    %368 = vector.multi_reduction <add>, %367, %cst_59 [1] : vector<2x32xf32> to vector<2xf32>
    %369 = vector.shape_cast %368 : vector<2xf32> to vector<2x1xf32>
    %370 = vector.broadcast %11 : f32 to vector<2x1xf32>
    %371 = arith.addf %369, %370 : vector<2x1xf32>
    %c0_60 = arith.constant 0 : index
    %c0_61 = arith.constant 0 : index
    %372 = vector.load %arg3[%c0_60, %c0_61] : memref<2x1xf32, #tpu.memory_space<vmem>>, vector<2x1xf32>
    tpu.vector_store %arg3[%c0_60, %c0_61], %371 {strides = array<i32>} : memref<2x1xf32, #tpu.memory_space<vmem>>, vector<2x1xf32>,
    return
  }
}

</mosaic_0001>

<bundles_post_ra>
// kernel: forward.1
= control target key start
LH: loop header
LB: loop body
LE: loop exit
PB: predicated region body
PF: predicated region fallthrough
CT: control target
= control target key end

     0   :  { %9 = vsyncpa [#allocation4], 0  ;;  %s2446_s12 = smov [#allocation3]   ;;  %s2855_s0 = inlined_call_operand.vmem [shape: f32[2,8,4], index: 0, kind: input, shape index: {}]   ;;  %s2856_s1 = inlined_call_operand.hbm [shape: f32[112,128], index: 1, kind: input, shape index: {}]   ;;  %s2857_s2 = inlined_call_operand.<no memory space> [shape: f32[1,1], index: 2, kind: input, shape index: {}]   ;;  %s2858_s3 = inlined_call_operand.vmem [shape: f32[2,1], index: 3, kind: output, shape index: {}]  }
   0x1   :  { %s17_s13 = sshll.u32 %s2446_s12, 4  ;;  %s2422_s16 = scalar_lea.hbm %s2856_s1, 1792  ;;  %s18_s13 = int_to_ptr.vmem [resolvable:$true] %s17_s13 }
   0x2   :  { %p2423_p0 = scmp.ne.s32.totalorder %s2856_s1, %s2422_s16  ;;  %p2426_p1 = scmp.lt.u32.totalorder %s2422_s16, %s2856_s1 }
   0x4   :  { %p2428_p2 = pnand %p2426_p1, %p2423_p0 }
   0x6   :  { %2431 = shalt.err (!%p2428_p2)
}
   0x7   :  { %s2432_s21 = scalar_lea.vmem %s18_s13, 1792  ;;  %p2437_p4 = scmp.lt.s32.totalorder %s18_s13, %s18_s13 }
   0x8   :  { %p2433_p3 = scmp.ne.s32.totalorder %s18_s13, %s2432_s21  ;;  %p2438_p5 = scmp.lt.s32.totalorder %s2432_s21, %s2432_s21 }
   0xa   :  { %p2439_p6 = por %p2438_p5, %p2437_p4 }
   0xc   :  { %p2440_p7 = pnand %p2439_p6, %p2433_p3 }
   0xe   :  { %2443 = shalt.err (!%p2440_p7)
}
   0xf   :  { %s2447_s22 = smov 128   ;;  %s2448_s23 = smov 8  }
  0x10   :  { %23 = dma.hbm_to_vmem [thread:$0]  %s2856_s1, 1792, %s18_s13, [#allocation4], %s2447_s22, %s2447_s22, %s2448_s23  }
  0x11   :  { %2444 = dma.done.wait [#allocation4], 1792  }
  0x12   :  { %2445 = vsyncadd [#allocation4], 4294965504  ;;  %v2449_v0 = vmov 0.0|0.0   ;;  %vm2450_vm0 = vmmov 0   ;;  %v2451_v1 = vmov 0.0   ;;  %v2496_v2 = vld [vmem:[%s2855_s0] sm:$0xff] }
  0x13   :  { %2173 = vmatprep.subr.bf16.mxu0 %v2449_v0  ;;  %2179 = vmatprep.subr.bf16.mxu1 %v2449_v0  ;;  %v2501_v3 = vld [vmem:[%s2855_s0 + $0x8] sm:$0xff]  ;;  %vm63_vm1 = vcmask 1041409   ;;  %v29_v4 = vld [vmem:[#allocation3] sm:$0xff]  ;;  %v31_v7 = vld [vmem:[#allocation3 + $0x10] sm:$0xff]  ;;  %s2452_s29 = smov 32   ;;  %vm74_vm2 = vcmask 1043456  }
  0x14   :  { %1927 = vmatprep.mubr.msk.f32.mxu0 %vm2450_vm0, %v2451_v1  ;;  %1946 = vmatprep.mubr.msk.f32.mxu1 %vm2450_vm0, %v2451_v1  ;;  %v62_v5 = vrot.slane %v2501_v3, 7  ;;  %v30_v6 = vld [vmem:[#allocation3 + $0x8] sm:$0xff]  ;;  %v32_v8 = vld [vmem:[#allocation3 + $0x18] sm:$0xff]  ;;  %v2515_v12 = vld [vmem:[#allocation3 + $0x20] sm:$0xf]  ;;  %vm68_vm3 = vcmask 261120  }
  0x15   :  { %v2504_v9 = vpack.c.bf16 %v30_v6, %v29_v4  ;;  %v2510_v11 = vpack.c.bf16 %v32_v8, %v31_v7  ;;  %vm70_vm4 = vcmask 293888   ;;  %v2531_v15 = vld [vmem:[#allocation3 + $0x68] ss:$0 sm:$0xff]  ;;  %s2453_s0 = smov 64   ;;  %v35_v28 = vld [vmem:[#allocation3 + $0x30] sm:$0xff]  ;;  %v36_v29 = vld [vmem:[#allocation3 + $0x38] sm:$0xff] }
  0x16   :  { %v64_v10 = vsel %vm63_vm1, %v62_v5, %v2496_v2  ;;  %v34_v27 = vld [vmem:[#allocation3 + $0x28] sm:$0xff]  ;;  %v37_v31 = vld [vmem:[#allocation3 + $0x40] sm:$0xff]  ;;  %v39_v34 = vld [vmem:[#allocation3 + $0x50] sm:$0xff]  ;;  %v277_v35 = vrot.slane %v2496_v2, 1  ;;  %s2454_s30 = smov 96   ;;  %vm178_vm5 = vcmask 523264  }
  0x17   :  { %65 = vrot.lane.b32.xlu0 %v64_v10, %s2452_s29  ;;  %2175 = vmatpush3.bf16.msra.mxu0 %v2504_v9  ;;  %v2536_v30 = vpack.c.bf16 %v35_v28, %v34_v27  ;;  %v2539_v32 = vpack.c.bf16 %v37_v31, %v36_v29  ;;  %v38_v33 = vld [vmem:[#allocation3 + $0x48] sm:$0xff]  ;;  %v40_v38 = vld [vmem:[#allocation3 + $0x58] sm:$0xff]  ;;  %v41_v39 = vld [vmem:[#allocation3 + $0x60] sm:$0xff]  ;;  %vm1741_vm6 = vcmask 254976   ;;  %vm1747_vm7 = vcmask 1024  }
  0x18   :  { %2176 = vmatprep.subr.bf16.mxu0 %v2449_v0  ;;  %v2544_v36 = vpack.c.bf16 %v39_v34, %v38_v33  ;;  %v278_v40 = vsel %vm63_vm1, %v2501_v3, %v277_v35  ;;  %v2551_v41 = vpack.c.bf16 %v41_v39, %v40_v38  ;;  %v2585_v56 = vld [vmem:[#allocation3 + $0x69] ss:$0 sm:$0xff] }
  0x19   :  { %2181 = vmatpush3.bf16.msra.mxu1 %v2536_v30 }
  0x1a   :  { %2182 = vmatprep.subr.bf16.mxu1 %v2449_v0 }
  0x1b   :  { %2178 = vmatpush3.bf16.msra.mxu0 %v2510_v11 }
  0x1c   :  { %1925 = vmatprep.subr.mxu0 %v2451_v1 }
  0x1d   :  { %2184 = vmatpush3.bf16.msra.mxu1 %v2539_v32 }
  0x1e   :  { %2185 = vmatprep.subr.bf16.mxu1 %v2449_v0 }
  0x1f   :  { %1926 = vmatpush3.msk.msra.mxu0 %vm74_vm2, %v2515_v12 }
  0x20   :  { %2191 = vmatprep.subr.bf16.mxu0 %v2449_v0 }
  0x21   :  { %2187 = vmatpush3.bf16.msra.mxu1 %v2544_v36 }
  0x22   :  { %2188 = vmatprep.subr.bf16.mxu1 %v2449_v0 }
  0x25   :  { %2190 = vmatpush3.bf16.msra.mxu1 %v2551_v41 }
  0x26   :  { %2197 = vmatprep.subr.bf16.mxu1 %v2449_v0 }
  0x89   :  { %v66_v13 = vpop.permute.xlu0 %65 }
  0x8a   :  { %v69_v14 = vsel %vm68_vm3, 0.0, %v66_v13 }
  0x8b   :  { %1928 = vmatmul.mubr.msk.f32.vlgmr.msra.gmra.mrb[0].mxu0 %vm70_vm4, %v69_v14 }
  0x8c   :  { %2193 = vmatpush3.bf16.msra.mxu0 %v2504_v9  ;;  %1959 = vmatprep.mubr.msk.f32.mxu0 %vm2450_vm0, %v2451_v1 }
  0x8d   :  { %2194 = vmatprep.subr.bf16.mxu0 %v2449_v0 }
  0x90   :  { %2196 = vmatpush3.bf16.msra.mxu0 %v2510_v11 }
  0x91   :  { %1957 = vmatprep.subr.mxu0 %v2451_v1 }
  0x94   :  { %1958 = vmatpush3.msk.msra.mxu0 %vm74_vm2, %v2515_v12 }
  0x95   :  { %2209 = vmatprep.subr.bf16.mxu0 %v2449_v0 }
 0x15e   :  { %v144_v16 = vpop.f32.mrb[0].mxu0 }
 0x15f   :  { %v145_v17 = vadd.f32 %v2531_v15, %v144_v16  ;;  %v1929_v18 = vpop.f32.mrb[1].mxu0  ;;  %v484_v16 = vrot.slane %v2496_v2, 2 }
 0x161   :  { %155 = vrot.lane.b32.xlu0 %v145_v17, %s2452_s29  ;;  %v1759_v19 = vmul.f32 -1.442695, %v145_v17 }
 0x163   :  { %2326 = vpow2.f32 %v1759_v19 }
 0x16d   :  { %v2327_v20 = vpop.eup %2326 }
 0x16e   :  { %v151_v21 = vadd.f32 1.0, %v2327_v20 }
 0x170   :  { %2328 = vrcp.f32 %v151_v21 }
 0x17a   :  { %v2329_v22 = vpop.eup %2328 }
 0x17b   :  { %v165_v42 = vsub.f32 1.0, %v2329_v22  ;;  %v171_v44 = vmul.f32 0.0, %v2329_v22 }
 0x1d3   :  { %v156_v23 = vpop.permute.xlu0 %155 }
 0x1d4   :  { %v158_v24 = vmul.f32 %v2329_v22, %v156_v23 }
 0x1d6   :  { %160 = vrot.lane.b32.xlu1 %v158_v24, %s2453_s0 }
 0x248   :  { %v161_v25 = vpop.permute.xlu1 %160 }
 0x249   :  { %v163_v26 = vadd.f32 %v161_v25, %v145_v17  ;;  %v485_v17 = vrot.slane %v2501_v3, 1 }
 0x24b   :  { %2330 = vtanh.f32 %v163_v26  ;;  %v486_v18 = vsel %vm63_vm1, %v485_v17, %v484_v16 }
 0x255   :  { %v2331_v37 = vpop.eup %2330 }
 0x256   :  { %167 = vrot.lane.b32.xlu1 %v2331_v37, %s2454_s30 }
 0x25a   :  { %279 = vrot.lane.b32.xlu1 %v278_v40, %s2452_s29 }
 0x2c8   :  { %v168_v43 = vpop.permute.xlu1 %167 }
 0x2c9   :  { %v170_v45 = vmul.f32 %v168_v43, %v165_v42 }
 0x2cb   :  { %v2557_v46 = vadd.f32 %v171_v44, %v170_v45 }
 0x2cc   :  { %v280_v47 = vpop.permute.xlu1 %279 }
 0x2cd   :  { %174 = vrot.lane.b32.xlu0 %v2557_v46, %s2454_s30 }
 0x33f   :  { %v175_v48 = vpop.permute.xlu0 %174 }
 0x340   :  { %v177_v49 = vsel %vm68_vm3, %v175_v48, 0.0  ;;  %v282_v50 = vsel %vm68_vm3, %v175_v48, %v280_v47 }
 0x341   :  { %1947 = vmatmul.mubr.msk.f32.vlgmr.msra.gmra.mrb[0].mxu1 %vm178_vm5, %v177_v49  ;;  %1960 = vmatmul.mubr.msk.f32.vlgmr.msra.gmra.mrb[2].mxu0 %vm70_vm4, %v282_v50 }
 0x342   :  { %2211 = vmatpush3.bf16.msra.mxu0 %v2504_v9  ;;  %2199 = vmatpush3.bf16.msra.mxu1 %v2536_v30 }
 0x343   :  { %2212 = vmatprep.subr.bf16.mxu0 %v2449_v0  ;;  %2200 = vmatprep.subr.bf16.mxu1 %v2449_v0 }
 0x344   :  { %1991 = vmatprep.mubr.msk.f32.mxu0 %vm2450_vm0, %v2451_v1  ;;  %1978 = vmatprep.mubr.msk.f32.mxu1 %vm2450_vm0, %v2451_v1 }
 0x346   :  { %2214 = vmatpush3.bf16.msra.mxu0 %v2510_v11  ;;  %2202 = vmatpush3.bf16.msra.mxu1 %v2539_v32 }
 0x347   :  { %1989 = vmatprep.subr.mxu0 %v2451_v1  ;;  %2203 = vmatprep.subr.bf16.mxu1 %v2449_v0 }
 0x34a   :  { %1990 = vmatpush3.msk.msra.mxu0 %vm74_vm2, %v2515_v12  ;;  %2205 = vmatpush3.bf16.msra.mxu1 %v2544_v36 }
 0x34b   :  { %2206 = vmatprep.subr.bf16.mxu1 %v2449_v0  ;;  %2215 = vmatprep.subr.bf16.mxu0 %v2449_v0 }
 0x34e   :  { %2208 = vmatpush3.bf16.msra.mxu1 %v2551_v41 }
 0x34f   :  { %2233 = vmatprep.subr.bf16.mxu1 %v2449_v0 }
 0x414   :  { %v248_v51 = vpop.f32.mrb[0].mxu1  ;;  %v352_v52 = vpop.f32.mrb[2].mxu0 }
 0x415   :  { %v353_v53 = vadd.f32 %v2531_v15, %v352_v52  ;;  %v1948_v54 = vpop.f32.mrb[1].mxu1  ;;  %v1961_v55 = vpop.f32.mrb[3].mxu0  ;;  %v249_v57 = vadd.f32 %v2585_v56, %v248_v51 }
 0x417   :  { %363 = vrot.lane.b32.xlu0 %v353_v53, %s2452_s29  ;;  %v1764_v58 = vmul.f32 -1.442695, %v353_v53  ;;  %v1761_v59 = vmul.f32 -1.442695, %v249_v57 }
 0x419   :  { %2332 = vpow2.f32 %v1764_v58 }
 0x41a   :  { %2334 = vpow2.f32 %v1761_v59 }
 0x41b   :  { %259 = vrot.lane.b32.xlu0 %v249_v57, %s2452_s29 }
 0x423   :  { %v2333_v60 = vpop.eup %2332 }
 0x424   :  { %v359_v61 = vadd.f32 1.0, %v2333_v60  ;;  %v2335_v62 = vpop.eup %2334 }
 0x425   :  { %v255_v63 = vadd.f32 1.0, %v2335_v62 }
 0x426   :  { %2336 = vrcp.f32 %v359_v61 }
 0x427   :  { %2338 = vrcp.f32 %v255_v63 }
 0x430   :  { %v2337_v4 = vpop.eup %2336 }
 0x431   :  { %v2339_v7 = vpop.eup %2338  ;;  %v373_v22 = vsub.f32 1.0, %v2337_v4  ;;  %v379_v24 = vmul.f32 %v2337_v4, %v2557_v46 }
 0x432   :  { %v269_v33 = vsub.f32 1.0, %v2339_v7  ;;  %v275_v35 = vmul.f32 0.0, %v2339_v7 }
 0x489   :  { %v364_v5 = vpop.permute.xlu0 %363 }
 0x48a   :  { %v366_v6 = vmul.f32 %v2337_v4, %v364_v5  ;;  %v692_v5 = vrot.slane %v2496_v2, 3 }
 0x48c   :  { %368 = vrot.lane.b32.xlu1 %v366_v6, %s2453_s0  ;;  %v693_v6 = vrot.slane %v2501_v3, 2 }
 0x48d   :  { %v260_v8 = vpop.permute.xlu0 %259 }
 0x48e   :  { %v262_v10 = vmul.f32 %v2339_v7, %v260_v8  ;;  %v694_v8 = vsel %vm63_vm1, %v693_v6, %v692_v5 }
 0x490   :  { %264 = vrot.lane.b32.xlu0 %v262_v10, %s2453_s0 }
 0x494   :  { %487 = vrot.lane.b32.xlu0 %v486_v18, %s2452_s29 }
 0x4fe   :  { %v369_v13 = vpop.permute.xlu1 %368 }
 0x4ff   :  { %v371_v14 = vadd.f32 %v369_v13, %v353_v53 }
 0x501   :  { %2340 = vtanh.f32 %v371_v14 }
 0x502   :  { %v265_v20 = vpop.permute.xlu0 %264 }
 0x503   :  { %v267_v21 = vadd.f32 %v265_v20, %v249_v57 }
 0x505   :  { %2342 = vtanh.f32 %v267_v21 }
 0x506   :  { %v488_v28 = vpop.permute.xlu0 %487 }
 0x50b   :  { %v2341_v19 = vpop.eup %2340 }
 0x50c   :  { %375 = vrot.lane.b32.xlu1 %v2341_v19, %s2454_s30 }
 0x50f   :  { %v2343_v27 = vpop.eup %2342 }
 0x57e   :  { %v376_v23 = vpop.permute.xlu1 %375 }
 0x57f   :  { %v378_v25 = vmul.f32 %v376_v23, %v373_v22 }
 0x581   :  { %v2598_v26 = vadd.f32 %v379_v24, %v378_v25 }
 0x583   :  { %382 = vrot.lane.b32.xlu1 %v2598_v26, %s2454_s30 }
 0x587   :  { %271 = vrot.lane.b32.xlu1 %v2343_v27, %s2454_s30 }
 0x5f5   :  { %v383_v29 = vpop.permute.xlu1 %382 }
 0x5f6   :  { %v490_v31 = vsel %vm68_vm3, %v383_v29, %v488_v28 }
 0x5f7   :  { %1992 = vmatmul.mubr.msk.f32.vlgmr.msra.gmra.mrb[4].mxu0 %vm70_vm4, %v490_v31 }
 0x5f8   :  { %2217 = vmatpush3.bf16.msra.mxu0 %v2536_v30  ;;  %2010 = vmatprep.mubr.msk.f32.mxu0 %vm2450_vm0, %v2451_v1 }
 0x5f9   :  { %v272_v34 = vpop.permute.xlu1 %271  ;;  %2218 = vmatprep.subr.bf16.mxu0 %v2449_v0 }
 0x5fa   :  { %v274_v37 = vmul.f32 %v272_v34, %v269_v33 }
 0x5fc   :  { %v2609_v38 = vadd.f32 %v275_v35, %v274_v37  ;;  %2220 = vmatpush3.bf16.msra.mxu0 %v2539_v32 }
 0x5fd   :  { %2221 = vmatprep.subr.bf16.mxu0 %v2449_v0 }
 0x5fe   :  { %v385_v39 = vsel %vm68_vm3, %v383_v29, %v2609_v38 }
 0x5ff   :  { %1979 = vmatmul.mubr.msk.f32.vlgmr.msra.gmra.mrb[2].mxu1 %vm178_vm5, %v385_v39 }
 0x600   :  { %2223 = vmatpush3.bf16.msra.mxu0 %v2544_v36  ;;  %2235 = vmatpush3.bf16.msra.mxu1 %v2536_v30 }
 0x601   :  { %2224 = vmatprep.subr.bf16.mxu0 %v2449_v0  ;;  %2236 = vmatprep.subr.bf16.mxu1 %v2449_v0 }
 0x602   :  { %2042 = vmatprep.mubr.msk.f32.mxu1 %vm2450_vm0, %v2451_v1 }
 0x604   :  { %2226 = vmatpush3.bf16.msra.mxu0 %v2551_v41  ;;  %2238 = vmatpush3.bf16.msra.mxu1 %v2539_v32 }
 0x605   :  { %2227 = vmatprep.subr.bf16.mxu0 %v2449_v0  ;;  %2239 = vmatprep.subr.bf16.mxu1 %v2449_v0 }
 0x608   :  { %2241 = vmatpush3.bf16.msra.mxu1 %v2544_v36 }
 0x609   :  { %2242 = vmatprep.subr.bf16.mxu1 %v2449_v0 }
 0x60c   :  { %2244 = vmatpush3.bf16.msra.mxu1 %v2551_v41 }
 0x60d   :  { %2263 = vmatprep.subr.bf16.mxu1 %v2449_v0 }
 0x6ca   :  { %v560_v40 = vpop.f32.mrb[4].mxu0 }
 0x6cb   :  { %v561_v42 = vadd.f32 %v2531_v15, %v560_v40  ;;  %v1993_v43 = vpop.f32.mrb[5].mxu0 }
 0x6cd   :  { %571 = vrot.lane.b32.xlu0 %v561_v42, %s2452_s29  ;;  %v1769_v47 = vmul.f32 -1.442695, %v561_v42 }
 0x6cf   :  { %2344 = vpow2.f32 %v1769_v47 }
 0x6d2   :  { %v455_v44 = vpop.f32.mrb[2].mxu1 }
 0x6d3   :  { %v456_v45 = vadd.f32 %v2585_v56, %v455_v44  ;;  %v1980_v46 = vpop.f32.mrb[3].mxu1  ;;  %v900_v44 = vrot.slane %v2496_v2, 4 }
 0x6d5   :  { %466 = vrot.lane.b32.xlu1 %v456_v45, %s2452_s29  ;;  %v1766_v48 = vmul.f32 -1.442695, %v456_v45 }
 0x6d7   :  { %2346 = vpow2.f32 %v1766_v48 }
 0x6d9   :  { %v2345_v49 = vpop.eup %2344 }
 0x6da   :  { %v567_v50 = vadd.f32 1.0, %v2345_v49 }
 0x6dc   :  { %2348 = vrcp.f32 %v567_v50 }
 0x6e1   :  { %v2347_v51 = vpop.eup %2346 }
 0x6e2   :  { %v462_v52 = vadd.f32 1.0, %v2347_v51 }
 0x6e4   :  { %2350 = vrcp.f32 %v462_v52 }
 0x6e6   :  { %v2349_v53 = vpop.eup %2348 }
 0x6e7   :  { %v581_v10 = vsub.f32 1.0, %v2349_v53  ;;  %v587_v14 = vmul.f32 %v2349_v53, %v2598_v26 }
 0x6ee   :  { %v2351_v57 = vpop.eup %2350 }
 0x6ef   :  { %v476_v19 = vsub.f32 1.0, %v2351_v57  ;;  %v482_v21 = vmul.f32 %v2351_v57, %v2609_v38 }
 0x73f   :  { %v572_v54 = vpop.permute.xlu0 %571 }
 0x740   :  { %v574_v55 = vmul.f32 %v2349_v53, %v572_v54 }
 0x742   :  { %576 = vrot.lane.b32.xlu0 %v574_v55, %s2453_s0 }
 0x747   :  { %v467_v58 = vpop.permute.xlu1 %466 }
 0x748   :  { %v469_v59 = vmul.f32 %v2351_v57, %v467_v58 }
 0x74a   :  { %471 = vrot.lane.b32.xlu1 %v469_v59, %s2453_s0 }
 0x7b4   :  { %v577_v60 = vpop.permute.xlu0 %576 }
 0x7b5   :  { %v579_v61 = vadd.f32 %v577_v60, %v561_v42 }
 0x7b7   :  { %2352 = vtanh.f32 %v579_v61 }
 0x7bc   :  { %v472_v62 = vpop.permute.xlu1 %471 }
 0x7bd   :  { %v474_v63 = vadd.f32 %v472_v62, %v456_v45  ;;  %v901_v45 = vrot.slane %v2501_v3, 3 }
 0x7bf   :  { %2354 = vtanh.f32 %v474_v63  ;;  %v902_v47 = vsel %vm63_vm1, %v901_v45, %v900_v44 }
 0x7c1   :  { %v2353_v4 = vpop.eup %2352 }
 0x7c2   :  { %583 = vrot.lane.b32.xlu0 %v2353_v4, %s2454_s30 }
 0x7c9   :  { %v2355_v7 = vpop.eup %2354 }
 0x7ca   :  { %478 = vrot.lane.b32.xlu1 %v2355_v7, %s2454_s30 }
 0x7ce   :  { %695 = vrot.lane.b32.xlu1 %v694_v8, %s2452_s29 }
 0x834   :  { %v584_v13 = vpop.permute.xlu0 %583 }
 0x835   :  { %v586_v16 = vmul.f32 %v584_v13, %v581_v10 }
 0x837   :  { %v588_v17 = vadd.f32 %v587_v14, %v586_v16 }
 0x839   :  { %590 = vrot.lane.b32.xlu0 %v588_v17, %s2454_s30 }
 0x83c   :  { %v479_v18 = vpop.permute.xlu1 %478 }
 0x83d   :  { %v481_v20 = vmul.f32 %v479_v18, %v476_v19 }
 0x83f   :  { %v2645_v22 = vadd.f32 %v482_v21, %v481_v20 }
 0x840   :  { %v696_v25 = vpop.permute.xlu1 %695 }
 0x8ab   :  { %v591_v23 = vpop.permute.xlu0 %590 }
 0x8ac   :  { %v593_v24 = vsel %vm68_vm3, %v591_v23, %v2645_v22  ;;  %v698_v26 = vsel %vm68_vm3, %v591_v23, %v696_v25 }
 0x8ad   :  { %2011 = vmatmul.mubr.msk.f32.vlgmr.msra.gmra.mrb[6].mxu0 %vm178_vm5, %v593_v24 }
 0x8ae   :  { %2229 = vmatpush3.bf16.msra.mxu0 %v2504_v9  ;;  %2023 = vmatprep.mubr.msk.f32.mxu0 %vm2450_vm0, %v2451_v1 }
 0x8af   :  { %2230 = vmatprep.subr.bf16.mxu0 %v2449_v0 }
 0x8b2   :  { %2232 = vmatpush3.bf16.msra.mxu0 %v2510_v11 }
 0x8b3   :  { %2021 = vmatprep.subr.mxu0 %v2451_v1 }
 0x8b6   :  { %2022 = vmatpush3.msk.msra.mxu0 %vm74_vm2, %v2515_v12 }
 0x8b7   :  { %2024 = vmatmul.mubr.msk.f32.vlgmr.msra.gmra.mrb[8].mxu0 %vm70_vm4, %v698_v26  ;;  %2245 = vmatprep.subr.bf16.mxu0 %v2449_v0 }
 0x8b8   :  { %2247 = vmatpush3.bf16.msra.mxu0 %v2504_v9  ;;  %2055 = vmatprep.mubr.msk.f32.mxu0 %vm2450_vm0, %v2451_v1 }
 0x8b9   :  { %2248 = vmatprep.subr.bf16.mxu0 %v2449_v0 }
 0x8bc   :  { %2250 = vmatpush3.bf16.msra.mxu0 %v2510_v11 }
 0x8bd   :  { %2053 = vmatprep.subr.mxu0 %v2451_v1 }
 0x8c0   :  { %2054 = vmatpush3.msk.msra.mxu0 %vm74_vm2, %v2515_v12 }
 0x8c1   :  { %2251 = vmatprep.subr.bf16.mxu0 %v2449_v0 }
 0x980   :  { %v663_v27 = vpop.f32.mrb[6].mxu0 }
 0x981   :  { %v2012_v28 = vpop.f32.mrb[7].mxu0  ;;  %v664_v53 = vadd.f32 %v2585_v56, %v663_v27 }
 0x982   :  { %v1108_v28 = vrot.slane %v2496_v2, 5 }
 0x983   :  { %v1771_v54 = vmul.f32 -1.442695, %v664_v53 }
 0x98a   :  { %v768_v29 = vpop.f32.mrb[8].mxu0 }
 0x98b   :  { %v769_v31 = vadd.f32 %v2531_v15, %v768_v29  ;;  %v2025_v33 = vpop.f32.mrb[9].mxu0  ;;  %v1109_v29 = vrot.slane %v2501_v3, 4 }
 0x98d   :  { %779 = vrot.lane.b32.xlu0 %v769_v31, %s2452_s29  ;;  %v1774_v34 = vmul.f32 -1.442695, %v769_v31  ;;  %v1110_v33 = vsel %vm63_vm1, %v1109_v29, %v1108_v28 }
 0x98f   :  { %2356 = vpow2.f32 %v1774_v34 }
 0x999   :  { %v2357_v35 = vpop.eup %2356 }
 0x99a   :  { %v775_v37 = vadd.f32 1.0, %v2357_v35 }
 0x99c   :  { %2358 = vrcp.f32 %v775_v37 }
 0x9a6   :  { %v2359_v38 = vpop.eup %2358 }
 0x9a7   :  { %v789_v48 = vsub.f32 1.0, %v2359_v38  ;;  %v795_v50 = vmul.f32 %v2359_v38, %v588_v17 }
 0x9ff   :  { %v780_v39 = vpop.permute.xlu0 %779 }
 0xa00   :  { %v782_v40 = vmul.f32 %v2359_v38, %v780_v39 }
 0xa02   :  { %784 = vrot.lane.b32.xlu1 %v782_v40, %s2453_s0 }
 0xa74   :  { %v785_v42 = vpop.permute.xlu1 %784 }
 0xa75   :  { %v787_v43 = vadd.f32 %v785_v42, %v769_v31 }
 0xa77   :  { %2360 = vtanh.f32 %v787_v43 }
 0xa78   :  { %2362 = vpow2.f32 %v1771_v54 }
 0xa81   :  { %v2361_v46 = vpop.eup %2360 }
 0xa82   :  { %791 = vrot.lane.b32.xlu0 %v2361_v46, %s2454_s30  ;;  %v2363_v55 = vpop.eup %2362 }
 0xa83   :  { %v670_v57 = vadd.f32 1.0, %v2363_v55 }
 0xa85   :  { %2364 = vrcp.f32 %v670_v57 }
 0xa86   :  { %903 = vrot.lane.b32.xlu0 %v902_v47, %s2452_s29 }
 0xa8f   :  { %v2365_v61 = vpop.eup %2364 }
 0xa90   :  { %v684_v13 = vsub.f32 1.0, %v2365_v61  ;;  %v690_v16 = vmul.f32 %v2365_v61, %v2645_v22 }
 0xaf4   :  { %v792_v49 = vpop.permute.xlu0 %791 }
 0xaf5   :  { %v794_v51 = vmul.f32 %v792_v49, %v789_v48 }
 0xaf7   :  { %v2678_v52 = vadd.f32 %v795_v50, %v794_v51 }
 0xaf8   :  { %v904_v58 = vpop.permute.xlu0 %903 }
 0xaf9   :  { %798 = vrot.lane.b32.xlu1 %v2678_v52, %s2454_s30 }
 0xafd   :  { %674 = vrot.lane.b32.xlu1 %v664_v53, %s2452_s29 }
 0xb6b   :  { %v799_v59 = vpop.permute.xlu1 %798 }
 0xb6c   :  { %v906_v60 = vsel %vm68_vm3, %v799_v59, %v904_v58 }
 0xb6d   :  { %2056 = vmatmul.mubr.msk.f32.vlgmr.msra.gmra.mrb[10].mxu0 %vm70_vm4, %v906_v60 }
 0xb6e   :  { %2253 = vmatpush3.bf16.msra.mxu0 %v2536_v30  ;;  %2074 = vmatprep.mubr.msk.f32.mxu0 %vm2450_vm0, %v2451_v1 }
 0xb6f   :  { %v675_v62 = vpop.permute.xlu1 %674  ;;  %2254 = vmatprep.subr.bf16.mxu0 %v2449_v0 }
 0xb70   :  { %v677_v63 = vmul.f32 %v2365_v61, %v675_v62 }
 0xb72   :  { %679 = vrot.lane.b32.xlu0 %v677_v63, %s2453_s0  ;;  %2256 = vmatpush3.bf16.msra.mxu0 %v2539_v32 }
 0xb73   :  { %2257 = vmatprep.subr.bf16.mxu0 %v2449_v0 }
 0xb76   :  { %2259 = vmatpush3.bf16.msra.mxu0 %v2544_v36 }
 0xb77   :  { %2260 = vmatprep.subr.bf16.mxu0 %v2449_v0 }
 0xb7a   :  { %2262 = vmatpush3.bf16.msra.mxu0 %v2551_v41 }
 0xb7b   :  { %2281 = vmatprep.subr.bf16.mxu0 %v2449_v0 }
 0xbe4   :  { %v680_v4 = vpop.permute.xlu0 %679 }
 0xbe5   :  { %v682_v5 = vadd.f32 %v680_v4, %v664_v53 }
 0xbe7   :  { %2366 = vtanh.f32 %v682_v5 }
 0xbf1   :  { %v2367_v6 = vpop.eup %2366 }
 0xbf2   :  { %686 = vrot.lane.b32.xlu1 %v2367_v6, %s2454_s30 }
 0xc40   :  { %v976_v7 = vpop.f32.mrb[10].mxu0 }
 0xc41   :  { %v977_v8 = vadd.f32 %v2531_v15, %v976_v7  ;;  %v2057_v10 = vpop.f32.mrb[11].mxu0 }
 0xc43   :  { %987 = vrot.lane.b32.xlu0 %v977_v8, %s2452_s29  ;;  %v1779_v20 = vmul.f32 -1.442695, %v977_v8 }
 0xc45   :  { %2368 = vpow2.f32 %v1779_v20  ;;  %v1316_v20 = vrot.slane %v2496_v2, 6 }
 0xc4f   :  { %v2369_v21 = vpop.eup %2368 }
 0xc50   :  { %v983_v22 = vadd.f32 1.0, %v2369_v21  ;;  %v1317_v21 = vrot.slane %v2501_v3, 5 }
 0xc52   :  { %2370 = vrcp.f32 %v983_v22 }
 0xc5c   :  { %v2371_v23 = vpop.eup %2370 }
 0xc5d   :  { %v997_v37 = vsub.f32 1.0, %v2371_v23  ;;  %v1003_v39 = vmul.f32 %v2371_v23, %v2678_v52 }
 0xc64   :  { %v687_v14 = vpop.permute.xlu1 %686 }
 0xc65   :  { %v689_v17 = vmul.f32 %v687_v14, %v684_v13 }
 0xc67   :  { %v2701_v18 = vadd.f32 %v690_v16, %v689_v17 }
 0xc69   :  { %v801_v19 = vsel %vm68_vm3, %v799_v59, %v2701_v18 }
 0xc6a   :  { %2043 = vmatmul.mubr.msk.f32.vlgmr.msra.gmra.mrb[4].mxu1 %vm178_vm5, %v801_v19 }
 0xc6b   :  { %2265 = vmatpush3.bf16.msra.mxu1 %v2504_v9  ;;  %2087 = vmatprep.mubr.msk.f32.mxu1 %vm2450_vm0, %v2451_v1 }
 0xc6c   :  { %2266 = vmatprep.subr.bf16.mxu1 %v2449_v0 }
 0xc6f   :  { %2268 = vmatpush3.bf16.msra.mxu1 %v2510_v11 }
 0xc70   :  { %2085 = vmatprep.subr.mxu1 %v2451_v1 }
 0xc73   :  { %2086 = vmatpush3.msk.msra.mxu1 %vm74_vm2, %v2515_v12 }
 0xc74   :  { %2269 = vmatprep.subr.bf16.mxu1 %v2449_v0 }
 0xcb5   :  { %v988_v24 = vpop.permute.xlu0 %987 }
 0xcb6   :  { %v990_v25 = vmul.f32 %v2371_v23, %v988_v24  ;;  %v1318_v24 = vsel %vm63_vm1, %v1317_v21, %v1316_v20 }
 0xcb8   :  { %992 = vrot.lane.b32.xlu1 %v990_v25, %s2453_s0 }
 0xd2a   :  { %v993_v26 = vpop.permute.xlu1 %992 }
 0xd2b   :  { %v995_v27 = vadd.f32 %v993_v26, %v977_v8 }
 0xd2d   :  { %2372 = vtanh.f32 %v995_v27 }
 0xd37   :  { %v2373_v31 = vpop.eup %2372 }
 0xd38   :  { %999 = vrot.lane.b32.xlu0 %v2373_v31, %s2454_s30 }
 0xd3c   :  { %1111 = vrot.lane.b32.xlu0 %v1110_v33, %s2452_s29 }
 0xd3d   :  { %v871_v34 = vpop.f32.mrb[4].mxu1 }
 0xd3e   :  { %v2044_v35 = vpop.f32.mrb[5].mxu1  ;;  %v872_v43 = vadd.f32 %v2585_v56, %v871_v34 }
 0xd40   :  { %v1776_v44 = vmul.f32 -1.442695, %v872_v43 }
 0xd42   :  { %2374 = vpow2.f32 %v1776_v44 }
 0xd4c   :  { %v2375_v45 = vpop.eup %2374 }
 0xd4d   :  { %v878_v46 = vadd.f32 1.0, %v2375_v45 }
 0xd4f   :  { %2376 = vrcp.f32 %v878_v46 }
 0xd59   :  { %v2377_v50 = vpop.eup %2376 }
 0xd5a   :  { %v892_v60 = vsub.f32 1.0, %v2377_v50  ;;  %v898_v62 = vmul.f32 %v2377_v50, %v2701_v18 }
 0xdaa   :  { %v1000_v38 = vpop.permute.xlu0 %999 }
 0xdab   :  { %v1002_v40 = vmul.f32 %v1000_v38, %v997_v37 }
 0xdad   :  { %v2722_v42 = vadd.f32 %v1003_v39, %v1002_v40 }
 0xdae   :  { %v1112_v47 = vpop.permute.xlu0 %1111 }
 0xdaf   :  { %1006 = vrot.lane.b32.xlu1 %v2722_v42, %s2454_s30 }
 0xdb3   :  { %882 = vrot.lane.b32.xlu1 %v872_v43, %s2452_s29 }
 0xe21   :  { %v1007_v48 = vpop.permute.xlu1 %1006 }
 0xe22   :  { %v1114_v49 = vsel %vm68_vm3, %v1007_v48, %v1112_v47 }
 0xe23   :  { %2088 = vmatmul.mubr.msk.f32.vlgmr.msra.gmra.mrb[6].mxu1 %vm70_vm4, %v1114_v49 }
 0xe24   :  { %2271 = vmatpush3.bf16.msra.mxu1 %v2536_v30  ;;  %2106 = vmatprep.mubr.msk.f32.mxu1 %vm2450_vm0, %v2451_v1 }
 0xe25   :  { %v883_v51 = vpop.permute.xlu1 %882  ;;  %2272 = vmatprep.subr.bf16.mxu1 %v2449_v0 }
 0xe26   :  { %v885_v52 = vmul.f32 %v2377_v50, %v883_v51 }
 0xe28   :  { %887 = vrot.lane.b32.xlu0 %v885_v52, %s2453_s0  ;;  %2274 = vmatpush3.bf16.msra.mxu1 %v2539_v32 }
 0xe29   :  { %2275 = vmatprep.subr.bf16.mxu1 %v2449_v0 }
 0xe2c   :  { %2277 = vmatpush3.bf16.msra.mxu1 %v2544_v36 }
 0xe2d   :  { %2278 = vmatprep.subr.bf16.mxu1 %v2449_v0 }
 0xe30   :  { %2280 = vmatpush3.bf16.msra.mxu1 %v2551_v41 }
 0xe31   :  { %2299 = vmatprep.subr.bf16.mxu1 %v2449_v0 }
 0xe9a   :  { %v888_v53 = vpop.permute.xlu0 %887 }
 0xe9b   :  { %v890_v54 = vadd.f32 %v888_v53, %v872_v43 }
 0xe9d   :  { %2378 = vtanh.f32 %v890_v54 }
 0xea7   :  { %v2379_v55 = vpop.eup %2378 }
 0xea8   :  { %894 = vrot.lane.b32.xlu1 %v2379_v55, %s2454_s30 }
 0xef6   :  { %v1184_v57 = vpop.f32.mrb[6].mxu1 }
 0xef7   :  { %v1185_v58 = vadd.f32 %v2531_v15, %v1184_v57  ;;  %v2089_v59 = vpop.f32.mrb[7].mxu1 }
 0xef9   :  { %1195 = vrot.lane.b32.xlu0 %v1185_v58, %s2452_s29  ;;  %v1784_v6 = vmul.f32 -1.442695, %v1185_v58 }
 0xefb   :  { %2380 = vpow2.f32 %v1784_v6 }
 0xf05   :  { %v2381_v7 = vpop.eup %2380 }
 0xf06   :  { %v1191_v8 = vadd.f32 1.0, %v2381_v7 }
 0xf08   :  { %2382 = vrcp.f32 %v1191_v8 }
 0xf12   :  { %v2383_v10 = vpop.eup %2382 }
 0xf13   :  { %v1205_v28 = vsub.f32 1.0, %v2383_v10  ;;  %v1211_v31 = vmul.f32 %v2383_v10, %v2722_v42 }
 0xf1a   :  { %v895_v61 = vpop.permute.xlu1 %894 }
 0xf1b   :  { %v897_v63 = vmul.f32 %v895_v61, %v892_v60 }
 0xf1d   :  { %v2745_v4 = vadd.f32 %v898_v62, %v897_v63 }
 0xf1f   :  { %v1009_v5 = vsel %vm68_vm3, %v1007_v48, %v2745_v4 }
 0xf20   :  { %2075 = vmatmul.mubr.msk.f32.vlgmr.msra.gmra.mrb[12].mxu0 %vm178_vm5, %v1009_v5 }
 0xf21   :  { %2283 = vmatpush3.bf16.msra.mxu0 %v2504_v9  ;;  %2119 = vmatprep.mubr.msk.f32.mxu0 %vm2450_vm0, %v2451_v1 }
 0xf22   :  { %2284 = vmatprep.subr.bf16.mxu0 %v2449_v0 }
 0xf25   :  { %2286 = vmatpush3.bf16.msra.mxu0 %v2510_v11 }
 0xf26   :  { %2117 = vmatprep.subr.mxu0 %v2451_v1 }
 0xf29   :  { %2118 = vmatpush3.msk.msra.mxu0 %vm74_vm2, %v2515_v12 }
 0xf2a   :  { %2287 = vmatprep.subr.bf16.mxu0 %v2449_v0 }
 0xf6b   :  { %v1196_v13 = vpop.permute.xlu0 %1195 }
 0xf6c   :  { %v1198_v14 = vmul.f32 %v2383_v10, %v1196_v13  ;;  %v1524_v13 = vrot.slane %v2496_v2, 7 }
 0xf6e   :  { %1200 = vrot.lane.b32.xlu1 %v1198_v14, %s2453_s0  ;;  %v1525_v14 = vrot.slane %v2501_v3, 6 }
 0xfe0   :  { %v1201_v16 = vpop.permute.xlu1 %1200 }
 0xfe1   :  { %v1203_v17 = vadd.f32 %v1201_v16, %v1185_v58 }
 0xfe3   :  { %2384 = vtanh.f32 %v1203_v17  ;;  %v1526_v17 = vsel %vm63_vm1, %v1525_v14, %v1524_v13 }
 0xfed   :  { %v2385_v18 = vpop.eup %2384 }
 0xfee   :  { %1207 = vrot.lane.b32.xlu0 %v2385_v18, %s2454_s30 }
 0xff3   :  { %v1079_v19 = vpop.f32.mrb[12].mxu0 }
 0xff4   :  { %v1080_v22 = vadd.f32 %v2585_v56, %v1079_v19  ;;  %v2076_v23 = vpop.f32.mrb[13].mxu0 }
 0xff6   :  { %1090 = vrot.lane.b32.xlu1 %v1080_v22, %s2452_s29  ;;  %v1781_v25 = vmul.f32 -1.442695, %v1080_v22 }
 0xff8   :  { %2386 = vpow2.f32 %v1781_v25 }
 0xffa   :  { %1319 = vrot.lane.b32.xlu1 %v1318_v24, %s2452_s29 }
0x1002   :  { %v2387_v26 = vpop.eup %2386 }
0x1003   :  { %v1086_v27 = vadd.f32 1.0, %v2387_v26 }
0x1005   :  { %2388 = vrcp.f32 %v1086_v27 }
0x100f   :  { %v2389_v35 = vpop.eup %2388 }
0x1010   :  { %v1100_v46 = vsub.f32 1.0, %v2389_v35  ;;  %v1106_v48 = vmul.f32 %v2389_v35, %v2745_v4 }
0x1060   :  { %v1208_v29 = vpop.permute.xlu0 %1207 }
0x1061   :  { %v1210_v33 = vmul.f32 %v1208_v29, %v1205_v28 }
0x1063   :  { %v2768_v34 = vadd.f32 %v1211_v31, %v1210_v33 }
0x1065   :  { %1214 = vrot.lane.b32.xlu0 %v2768_v34, %s2454_s30 }
0x1068   :  { %v1091_v37 = vpop.permute.xlu1 %1090 }
0x1069   :  { %v1093_v38 = vmul.f32 %v2389_v35, %v1091_v37 }
0x106b   :  { %1095 = vrot.lane.b32.xlu0 %v1093_v38, %s2453_s0 }
0x106c   :  { %v1320_v39 = vpop.permute.xlu1 %1319 }
0x10d7   :  { %v1215_v40 = vpop.permute.xlu0 %1214 }
0x10d8   :  { %v1322_v43 = vsel %vm68_vm3, %v1215_v40, %v1320_v39 }
0x10d9   :  { %2120 = vmatmul.mubr.msk.f32.vlgmr.msra.gmra.mrb[14].mxu0 %vm70_vm4, %v1322_v43 }
0x10da   :  { %2289 = vmatpush3.bf16.msra.mxu0 %v2536_v30  ;;  %2138 = vmatprep.mubr.msk.f32.mxu0 %vm2450_vm0, %v2451_v1 }
0x10db   :  { %2290 = vmatprep.subr.bf16.mxu0 %v2449_v0 }
0x10dd   :  { %v1096_v42 = vpop.permute.xlu0 %1095 }
0x10de   :  { %v1098_v44 = vadd.f32 %v1096_v42, %v1080_v22  ;;  %2292 = vmatpush3.bf16.msra.mxu0 %v2539_v32 }
0x10df   :  { %2293 = vmatprep.subr.bf16.mxu0 %v2449_v0 }
0x10e0   :  { %2390 = vtanh.f32 %v1098_v44 }
0x10e2   :  { %2295 = vmatpush3.bf16.msra.mxu0 %v2544_v36 }
0x10e3   :  { %2296 = vmatprep.subr.bf16.mxu0 %v2449_v0 }
0x10e6   :  { %2298 = vmatpush3.bf16.msra.mxu0 %v2551_v41 }
0x10ea   :  { %v2391_v45 = vpop.eup %2390 }
0x10eb   :  { %1102 = vrot.lane.b32.xlu1 %v2391_v45, %s2454_s30 }
0x115d   :  { %v1103_v47 = vpop.permute.xlu1 %1102 }
0x115e   :  { %v1105_v49 = vmul.f32 %v1103_v47, %v1100_v46 }
0x1160   :  { %v2786_v50 = vadd.f32 %v1106_v48, %v1105_v49 }
0x1162   :  { %v1217_v51 = vsel %vm68_vm3, %v1215_v40, %v2786_v50 }
0x1163   :  { %2107 = vmatmul.mubr.msk.f32.vlgmr.msra.gmra.mrb[8].mxu1 %vm178_vm5, %v1217_v51 }
0x1164   :  { %2301 = vmatpush3.bf16.msra.mxu1 %v2504_v9  ;;  %2151 = vmatprep.mubr.msk.f32.mxu1 %vm2450_vm0, %v2451_v1 }
0x1165   :  { %2302 = vmatprep.subr.bf16.mxu1 %v2449_v0 }
0x1168   :  { %2304 = vmatpush3.bf16.msra.mxu1 %v2510_v11 }
0x1169   :  { %2149 = vmatprep.subr.mxu1 %v2451_v1 }
0x116c   :  { %2150 = vmatpush3.msk.msra.mxu1 %vm74_vm2, %v2515_v12 }
0x116d   :  { %2305 = vmatprep.subr.bf16.mxu1 %v2449_v0 }
0x11ac   :  { %v1392_v52 = vpop.f32.mrb[14].mxu0 }
0x11ad   :  { %v1393_v53 = vadd.f32 %v2531_v15, %v1392_v52  ;;  %v2121_v54 = vpop.f32.mrb[15].mxu0 }
0x11af   :  { %1403 = vrot.lane.b32.xlu0 %v1393_v53, %s2452_s29  ;;  %v1789_v9 = vmul.f32 -1.442695, %v1393_v53 }
0x11b1   :  { %2392 = vpow2.f32 %v1789_v9 }
0x11bb   :  { %v2393_v55 = vpop.eup %2392 }
0x11bc   :  { %v1399_v57 = vadd.f32 1.0, %v2393_v55 }
0x11be   :  { %2394 = vrcp.f32 %v1399_v57 }
0x11c8   :  { %v2395_v58 = vpop.eup %2394 }
0x11c9   :  { %v1413_v18 = vsub.f32 1.0, %v2395_v58  ;;  %v1419_v20 = vmul.f32 %v2395_v58, %v2768_v34 }
0x1221   :  { %v1404_v11 = vpop.permute.xlu0 %1403 }
0x1222   :  { %v1406_v59 = vmul.f32 %v2395_v58, %v1404_v11 }
0x1224   :  { %1408 = vrot.lane.b32.xlu1 %v1406_v59, %s2453_s0 }
0x1236   :  { %v1287_v60 = vpop.f32.mrb[8].mxu1 }
0x1237   :  { %v1288_v12 = vadd.f32 %v2585_v56, %v1287_v60  ;;  %v2108_v61 = vpop.f32.mrb[9].mxu1 }
0x1239   :  { %1298 = vrot.lane.b32.xlu0 %v1288_v12, %s2452_s29  ;;  %v1786_v62 = vmul.f32 -1.442695, %v1288_v12 }
0x123b   :  { %2396 = vpow2.f32 %v1786_v62 }
0x1245   :  { %v2397_v5 = vpop.eup %2396 }
0x1246   :  { %v1294_v6 = vadd.f32 1.0, %v2397_v5 }
0x1296   :  { %v1409_v63 = vpop.permute.xlu1 %1408 }
0x1297   :  { %v1411_v4 = vadd.f32 %v1409_v63, %v1393_v53 }
0x1299   :  { %2398 = vtanh.f32 %v1411_v4 }
0x129a   :  { %2400 = vrcp.f32 %v1294_v6 }
0x12a3   :  { %v2399_v7 = vpop.eup %2398 }
0x12a4   :  { %1415 = vrot.lane.b32.xlu1 %v2399_v7, %s2454_s30  ;;  %v2401_v8 = vpop.eup %2400 }
0x12a5   :  { %v1308_v27 = vsub.f32 1.0, %v2401_v8  ;;  %v1314_v29 = vmul.f32 %v2401_v8, %v2786_v50 }
0x12ab   :  { %v1299_v10 = vpop.permute.xlu0 %1298 }
0x12ac   :  { %v1301_v16 = vmul.f32 %v2401_v8, %v1299_v10 }
0x12ae   :  { %1303 = vrot.lane.b32.xlu0 %v1301_v16, %s2453_s0 }
0x12b2   :  { %1527 = vrot.lane.b32.xlu0 %v1526_v17, %s2452_s29  ;;  %v1756_v17 = vld [vmem:[#allocation3 + $0x6a] ss:$0 sm:$0xff] }
0x1316   :  { %v1416_v19 = vpop.permute.xlu1 %1415 }
0x1317   :  { %v1418_v21 = vmul.f32 %v1416_v19, %v1413_v18 }
0x1319   :  { %v2812_v22 = vadd.f32 %v1419_v20, %v1418_v21 }
0x131b   :  { %1422 = vrot.lane.b32.xlu1 %v2812_v22, %s2454_s30 }
0x1320   :  { %v1304_v2 = vpop.permute.xlu0 %1303 }
0x1321   :  { %v1306_v23 = vadd.f32 %v1304_v2, %v1288_v12 }
0x1323   :  { %2402 = vtanh.f32 %v1306_v23 }
0x1324   :  { %v1528_v24 = vpop.permute.xlu0 %1527 }
0x132d   :  { %v2403_v3 = vpop.eup %2402 }
0x132e   :  { %1310 = vrot.lane.b32.xlu1 %v2403_v3, %s2454_s30 }
0x138d   :  { %v1423_v25 = vpop.permute.xlu1 %1422 }
0x138e   :  { %v1530_v26 = vsel %vm68_vm3, %v1423_v25, %v1528_v24 }
0x138f   :  { %2152 = vmatmul.mubr.msk.f32.vlgmr.msra.gmra.mrb[10].mxu1 %vm70_vm4, %v1530_v26 }
0x1390   :  { %2307 = vmatpush3.bf16.msra.mxu1 %v2536_v30  ;;  %2170 = vmatprep.mubr.msk.f32.mxu1 %vm2450_vm0, %v2451_v1 }
0x1391   :  { %2308 = vmatprep.subr.bf16.mxu1 %v2449_v0 }
0x1394   :  { %2310 = vmatpush3.bf16.msra.mxu1 %v2539_v32 }
0x1395   :  { %2311 = vmatprep.subr.bf16.mxu1 %v2449_v0 }
0x1398   :  { %2313 = vmatpush3.bf16.msra.mxu1 %v2544_v36 }
0x1399   :  { %2314 = vmatprep.subr.bf16.mxu1 %v2449_v0 }
0x139c   :  { %2316 = vmatpush3.bf16.msra.mxu1 %v2551_v41 }
0x13a0   :  { %v1311_v28 = vpop.permute.xlu1 %1310 }
0x13a1   :  { %v1313_v30 = vmul.f32 %v1311_v28, %v1308_v27  ;;  %v1745_v27 = vstv %s2857_s2 }
0x13a3   :  { %v1315_v31 = vadd.f32 %v1314_v29, %v1313_v30 }
0x13a5   :  { %v1425_v1 = vsel %vm68_vm3, %v1423_v25, %v1315_v31 }
0x13a6   :  { %2139 = vmatmul.mubr.msk.f32.vlgmr.msra.gmra.mrb[16].mxu0 %vm178_vm5, %v1425_v1 }
0x1462   :  { %v1600_v33 = vpop.f32.mrb[10].mxu1 }
0x1463   :  { %v1601_v32 = vadd.f32 %v2531_v15, %v1600_v33  ;;  %v2153_v34 = vpop.f32.mrb[11].mxu1 }
0x1465   :  { %1611 = vrot.lane.b32.xlu0 %v1601_v32, %s2452_s29  ;;  %v1794_v35 = vmul.f32 -1.442695, %v1601_v32 }
0x1467   :  { %2404 = vpow2.f32 %v1794_v35 }
0x1471   :  { %v2405_v37 = vpop.eup %2404 }
0x1472   :  { %v1607_v38 = vadd.f32 1.0, %v2405_v37 }
0x1474   :  { %2406 = vrcp.f32 %v1607_v38 }
0x1479   :  { %v1495_v36 = vpop.f32.mrb[16].mxu0 }
0x147a   :  { %v1496_v0 = vadd.f32 %v2585_v56, %v1495_v36  ;;  %v2140_v41 = vpop.f32.mrb[17].mxu0 }
0x147c   :  { %1506 = vrot.lane.b32.xlu1 %v1496_v0, %s2452_s29  ;;  %v1791_v39 = vmul.f32 -1.442695, %v1496_v0 }
0x147e   :  { %2408 = vpow2.f32 %v1791_v39  ;;  %v2407_v40 = vpop.eup %2406 }
0x147f   :  { %v1621_v54 = vsub.f32 1.0, %v2407_v40  ;;  %v1627_v55 = vmul.f32 %v2407_v40, %v2812_v22 }
0x1488   :  { %v2409_v15 = vpop.eup %2408 }
0x1489   :  { %v1502_v44 = vadd.f32 1.0, %v2409_v15 }
0x148b   :  { %2410 = vrcp.f32 %v1502_v44 }
0x1495   :  { %v2411_v45 = vpop.eup %2410 }
0x1496   :  { %v1516_v59 = vsub.f32 1.0, %v2411_v45  ;;  %v1522_v12 = vmul.f32 %v2411_v45, %v1315_v31 }
0x14d7   :  { %v1612_v43 = vpop.permute.xlu0 %1611 }
0x14d8   :  { %v1614_v42 = vmul.f32 %v2407_v40, %v1612_v43 }
0x14da   :  { %1616 = vrot.lane.b32.xlu0 %v1614_v42, %s2453_s0 }
0x14ee   :  { %v1507_v46 = vpop.permute.xlu1 %1506 }
0x14ef   :  { %v1509_v47 = vmul.f32 %v2411_v45, %v1507_v46 }
0x14f1   :  { %1511 = vrot.lane.b32.xlu1 %v1509_v47, %s2453_s0 }
0x154c   :  { %v1617_v48 = vpop.permute.xlu0 %1616 }
0x154d   :  { %v1619_v49 = vadd.f32 %v1617_v48, %v1601_v32 }
0x154f   :  { %2412 = vtanh.f32 %v1619_v49 }
0x1559   :  { %v2413_v50 = vpop.eup %2412 }
0x155a   :  { %1623 = vrot.lane.b32.xlu0 %v2413_v50, %s2454_s30 }
0x1563   :  { %v1512_v51 = vpop.permute.xlu1 %1511 }
0x1564   :  { %v1514_v52 = vadd.f32 %v1512_v51, %v1496_v0 }
0x1566   :  { %2414 = vtanh.f32 %v1514_v52 }
0x1570   :  { %v2415_v53 = vpop.eup %2414 }
0x1571   :  { %1518 = vrot.lane.b32.xlu1 %v2415_v53, %s2454_s30 }
0x15cc   :  { %v1624_v9 = vpop.permute.xlu0 %1623 }
0x15cd   :  { %v1626_v57 = vmul.f32 %v1624_v9, %v1621_v54 }
0x15cf   :  { %v1628_v58 = vadd.f32 %v1627_v55, %v1626_v57 }
0x15d1   :  { %1630 = vrot.lane.b32.xlu0 %v1628_v58, %s2454_s30 }
0x15e3   :  { %v1519_v11 = vpop.permute.xlu1 %1518 }
0x15e4   :  { %v1521_v60 = vmul.f32 %v1519_v11, %v1516_v59 }
0x15e6   :  { %v1523_v61 = vadd.f32 %v1522_v12, %v1521_v60 }
0x1643   :  { %v1631_v62 = vpop.permute.xlu0 %1630 }
0x1644   :  { %v1633_v63 = vsel %vm68_vm3, %v1631_v62, %v1523_v61 }
0x1645   :  { %2171 = vmatmul.mubr.msk.f32.vlgmr.msra.gmra.mrb[12].mxu1 %vm178_vm5, %v1633_v63 }
0x1718   :  { %v1703_v4 = vpop.f32.mrb[12].mxu1 }
0x1719   :  { %v1704_v5 = vadd.f32 %v2585_v56, %v1703_v4  ;;  %v2172_v6 = vpop.f32.mrb[13].mxu1 }
0x171b   :  { %1714 = vrot.lane.b32.xlu1 %v1704_v5, %s2452_s29  ;;  %v1796_v7 = vmul.f32 -1.442695, %v1704_v5 }
0x171d   :  { %2416 = vpow2.f32 %v1796_v7 }
0x1727   :  { %v2417_v8 = vpop.eup %2416 }
0x1728   :  { %v1710_v10 = vadd.f32 1.0, %v2417_v8 }
0x172a   :  { %2418 = vrcp.f32 %v1710_v10 }
0x1734   :  { %v2419_v13 = vpop.eup %2418 }
0x1735   :  { %v1724_v20 = vsub.f32 1.0, %v2419_v13  ;;  %v1730_v2 = vmul.f32 %v2419_v13, %v1523_v61 }
0x178d   :  { %v1715_v14 = vpop.permute.xlu1 %1714 }
0x178e   :  { %v1717_v16 = vmul.f32 %v2419_v13, %v1715_v14 }
0x1790   :  { %1719 = vrot.lane.b32.xlu0 %v1717_v16, %s2453_s0 }
0x1794   :  { %1733 = vrot.lane.b32.xlu0 %v1756_v17, %s2452_s29 }
0x1802   :  { %v1720_v18 = vpop.permute.xlu0 %1719 }
0x1803   :  { %v1722_v19 = vadd.f32 %v1720_v18, %v1704_v5 }
0x1805   :  { %2420 = vtanh.f32 %v1722_v19 }
0x1806   :  { %v1734_v23 = vpop.permute.xlu0 %1733 }
0x180f   :  { %v2421_v56 = vpop.eup %2420 }
0x1810   :  { %1726 = vrot.lane.b32.xlu1 %v2421_v56, %s2454_s30 }
0x1882   :  { %v1727_v21 = vpop.permute.xlu1 %1726 }
0x1883   :  { %v1729_v22 = vmul.f32 %v1727_v21, %v1724_v20 }
0x1885   :  { %v1731_v3 = vadd.f32 %v1730_v2, %v1729_v22 }
0x1887   :  { %v1736_v24 = vmul.f32 %v1734_v23, %v1731_v3 }
0x1889   :  { %1738 = vrot.lane.b32.xlu1 %v1736_v24, %s2454_s30 }
0x18fb   :  { %v1739_v25 = vpop.permute.xlu1 %1738 }
0x18fc   :  { %v1742_v26 = vsel %vm1741_vm6, %v1739_v25, 0.0 }
0x18fd   :  { %1743 = vadd.xlane.f32.xlu0 %v1742_v26 }
0x198a   :  { %v1744_v28 = vpop.xlane.xlu0 %1743 }
0x198b   :  { %v1746_v29 = vadd.f32 %v1745_v27, %v1744_v28 }
0x198d   :  { %1748 = vst.msk [vmem:[%s2858_s3] sm:$0x3] %vm1747_vm7, %v1746_v29 }
0x198e   :  { %1753 = vsyncpa [#allocation4], 1 }

</bundles_post_ra>
